<compile_context>
chip_gen: v5e
topology: v5e:2x2
jax: 0.10.0
libtpu: 0.0.40
codegen_flags: <defaults>
</compile_context>

<pallas_src>
import functools

import jax
import jax.numpy as jnp
from jax.experimental import pallas as pl
from jax.experimental.pallas import tpu as pltpu


MATMUL_DTYPE = jnp.bfloat16   # MXU-native everywhere; accumulation stays float32.
LANE = 128                    # TPU lane width; output_dim is padded to this.


# ----------------------------------------------------------------------------
# Single fused kernel: LSTM + head + pkgat stand-in + top-level fusion.
# ----------------------------------------------------------------------------
def _fused_kernel(p_ref,                         # SMEM (1,)  mixing coefficient p
                  x_ref,                         # (T*Bp, Din) time-major padded input
                  wih_ref, whh_ref, b_ref,       # (Din,4H), (H,4H), (1,4H)
                  wproj_ref, bproj_ref,          # (H,Op), (1,Op)   LSTM_Model head
                  wf_ref, wc_ref, wt_ref,        # (H,Op) each      pkgat stand-in
                  wlstm_ref, wkg_ref, wout_ref,  # (Op,Op) each     bias-free linears
                  dip_ref,                       # out (Bp, Op)     out_activation(lstm_out)
                  fct_ref,                       # out (3*Bp, Op)   [final_f; final_c; final_t]
                  *, T, Bp, H, Op, mm_dtype):
    f32 = jnp.float32

    def mm(a, b):
        return jnp.dot(a.astype(mm_dtype), b.astype(mm_dtype),
                       preferred_element_type=f32)

    # --- LSTM: hoist input projection out of the recurrence (one dot for all T). ---
    gx = mm(x_ref[...], wih_ref[...]) + b_ref[...]          # (T*Bp, 4H)
    whh = whh_ref[...].astype(mm_dtype)                     # cast once, reuse every step

    h = jnp.zeros((Bp, H), f32)
    c = jnp.zeros((Bp, H), f32)
    h_sum = jnp.zeros((Bp, H), f32)

    # T is a compile-time constant -> fully unrolled recurrence (LLO can interleave
    # the h@W_hh push, EUP sigmoid/tanh and VPU gate math of adjacent steps).
    for t in range(T):
        g = gx[t * Bp:(t + 1) * Bp, :] + jnp.dot(
            h.astype(mm_dtype), whh, preferred_element_type=f32)   # (Bp, 4H)
        # PyTorch gate order: i, f, g, o.  Gate math kept in f32.
        i_g = jax.nn.sigmoid(g[:, 0 * H:1 * H])
        f_g = jax.nn.sigmoid(g[:, 1 * H:2 * H])
        g_g = jnp.tanh(g[:, 2 * H:3 * H])
        o_g = jax.nn.sigmoid(g[:, 3 * H:4 * H])
        c = f_g * c + i_g * g_g
        h = o_g * jnp.tanh(c)
        h_sum = h_sum + h                       # running mean-pool of h_time (no HBM h_time)

    # LSTM_Model output head (activation='sigmoid').  Op is lane-dense (128-mult).
    lstm_out = jax.nn.sigmoid(mm(h, wproj_ref[...]) + bproj_ref[...])    # (Bp, Op)
    # only_dipole path: out_activation(lstm_out)  (double sigmoid, as in the reference).
    dip_ref[...] = jax.nn.sigmoid(lstm_out).astype(dip_ref.dtype)

    # TODO(synk): real pkgat (GATModel/GraphCare/MedPath/StageAware) source was not
    # provided; deterministic stand-in = tanh projections of mean-pooled h_time.
    h_pool = h_sum * (1.0 / T)
    h_f = jnp.tanh(mm(h_pool, wf_ref[...]))
    h_c = jnp.tanh(mm(h_pool, wc_ref[...]))
    h_t = jnp.tanh(mm(h_pool, wt_ref[...]))
    h_stack = jnp.concatenate([h_f, h_c, h_t], axis=0)       # (3*Bp, Op)

    # --- Top-level fusion: one Wkg dot + one Wout dot for all three branches. ---
    p = p_ref[0]
    final_lstm = p * mm(lstm_out, wlstm_ref[...])            # (Bp, Op)
    final_lstm3 = jnp.concatenate([final_lstm, final_lstm, final_lstm], axis=0)
    fin = final_lstm3 + (1.0 - p) * mm(h_stack, wkg_ref[...])
    fct_ref[...] = jax.nn.sigmoid(mm(fin, wout_ref[...])).astype(fct_ref.dtype)


# ----------------------------------------------------------------------------
# Wrapper: pad batch, flatten to time-major, one pallas_call, un-pad outputs.
# ----------------------------------------------------------------------------
def _fused_forward(x_btd, p,
                   wih_t, whh_t, b, wproj_t, bproj,
                   wf_t, wc_t, wt_t, wlstm_t, wkg_t, wout_t,
                   out_dim, mm_dtype=MATMUL_DTYPE):
    B, T, D = x_btd.shape
    H = whh_t.shape[0]
    Op = wproj_t.shape[1]                       # lane-padded output width
    Bp = int(pl.cdiv(B, 8) * 8)                 # pad batch to a full sublane width

    xp = jnp.pad(x_btd.astype(jnp.float32), ((0, Bp - B), (0, 0), (0, 0)))
    x_flat = jnp.transpose(xp, (1, 0, 2)).reshape(T * Bp, D)   # time-major, flattened
    p_arr = jnp.asarray(p, jnp.float32).reshape((1,))

    kernel = functools.partial(_fused_kernel, T=T, Bp=Bp, H=H, Op=Op,
                               mm_dtype=mm_dtype)
    vmem = lambda: pl.BlockSpec(memory_space=pltpu.MemorySpace.VMEM)
    smem = pl.BlockSpec(memory_space=pltpu.MemorySpace.SMEM)

    dip, fct = pl.pallas_call(
        kernel,
        out_shape=(jax.ShapeDtypeStruct((Bp, Op), jnp.float32),
                   jax.ShapeDtypeStruct((3 * Bp, Op), jnp.float32)),
        in_specs=[smem] + [vmem() for _ in range(12)],
        out_specs=(vmem(), vmem()),
    )(p_arr, x_flat, wih_t, whh_t, b, wproj_t, bproj,
      wf_t, wc_t, wt_t, wlstm_t, wkg_t, wout_t)

    dip = dip[:B, :out_dim]
    final_f = fct[0 * Bp:0 * Bp + B, :out_dim]
    final_c = fct[1 * Bp:1 * Bp + B, :out_dim]
    final_t = fct[2 * Bp:2 * Bp + B, :out_dim]
    return dip, final_f, final_c, final_t


_fused_forward_jit = jax.jit(_fused_forward, static_argnames=("out_dim", "mm_dtype"))


# ----------------------------------------------------------------------------
# Model wrapper with deterministic parameter init (output_dim lane-padded once).
# ----------------------------------------------------------------------------
class DiseasePredModelPallas:
    """Pallas TPU port of DiseasePredModel (model_type='LSTM' dipole branch)."""

    def __init__(self, input_dim, output_dim, hidden_dim, embed_dim, seed=0,
                 matmul_dtype=MATMUL_DTYPE):
        self.input_dim = input_dim
        self.output_dim = output_dim
        self.hidden_dim = hidden_dim
        self.embed_dim = embed_dim
        self.matmul_dtype = matmul_dtype

        key = jax.random.PRNGKey(seed)
        ks = jax.random.split(key, 12)

        def init(k, shape, fan_in):
            bound = 1.0 / jnp.sqrt(jnp.float32(fan_in))
            return jax.random.uniform(k, shape, jnp.float32, -bound, bound)

        H, D, O = hidden_dim, input_dim, output_dim
        Op = int(pl.cdiv(O, LANE) * LANE)       # lane-dense output width
        self._op = Op

        def pad_cols(w):                        # (r, O) -> (r, Op), zero columns
            return jnp.pad(w, ((0, 0), (0, Op - O)))

        def pad_both(w):                        # (O, O) -> (Op, Op), zero rows+cols
            return jnp.pad(w, ((0, Op - O), (0, Op - O)))

        # LSTM (dipole) params, pre-transposed for y = x @ W_T
        self.wih_t = init(ks[0], (D, 4 * H), D)
        self.whh_t = init(ks[1], (H, 4 * H), H)
        self.b = init(ks[2], (1, 4 * H), H) + init(ks[3], (1, 4 * H), H)
        self.wproj_t = pad_cols(init(ks[4], (H, O), H))
        self.bproj = pad_cols(init(ks[5], (1, O), H))
        # top-level linear layers (bias=False), pre-transposed; zero padding keeps
        # the padded lanes from contributing to the true output columns.
        self.wlstm_t = pad_both(init(ks[6], (O, O), O))
        self.wkg_t = pad_both(init(ks[7], (O, O), O))
        self.wout_t = pad_both(init(ks[8], (O, O), O))
        # TODO(synk): GATModel / GraphCare / MedPath / StageAware sources were not
        # provided with DiseasePredModel; pkgat is a deterministic stand-in
        # (mean-pool of h_time + tanh projections) implemented inside the kernel.
        self.wf_t = pad_cols(init(ks[9], (H, O), H))
        self.wc_t = pad_cols(init(ks[10], (H, O), H))
        self.wt_t = pad_cols(init(ks[11], (H, O), H))

    def __call__(self, feature_index, rel_index, feat_index, only_dipole, p):
        # TODO(synk): rel_index / feat_index feed the real pkgat graph module; the
        # stand-in ignores them.
        dip, final_f, final_c, final_t = _fused_forward_jit(
            feature_index, p,
            self.wih_t, self.whh_t, self.b, self.wproj_t, self.bproj,
            self.wf_t, self.wc_t, self.wt_t,
            self.wlstm_t, self.wkg_t, self.wout_t,
            out_dim=self.output_dim, mm_dtype=self.matmul_dtype)
        if only_dipole:
            return dip
        B, T, _ = feature_index.shape
        path_attentions = jnp.zeros((B, T, 1), jnp.float32)     # stand-in placeholders
        causal_attentions = jnp.zeros((B, T, 1), jnp.float32)
        return final_f, final_c, final_t, path_attentions, causal_attentions


# ----------------------------------------------------------------------------
if __name__ == "__main__":
    B, T = 2, 8
    input_dim, hidden_dim, output_dim, embed_dim = 16, 32, 16, 32

    key = jax.random.PRNGKey(0)
    k_x, k_rel, k_feat = jax.random.split(key, 3)
    # multi-hot-like dense feature input (B, T, input_dim)
    feature_index = (jax.random.uniform(k_x, (B, T, input_dim)) > 0.5
                     ).astype(jnp.float32)
    rel_index = jax.random.randint(k_rel, (B, T, 4), 0, input_dim)
    feat_index = jax.random.randint(k_feat, (B, T, 4), 0, input_dim)

    model = DiseasePredModelPallas(input_dim, output_dim, hidden_dim, embed_dim)

    # only_dipole=True path
    out_dip = model(feature_index, rel_index, feat_index, only_dipole=True, p=0.5)
    jax.block_until_ready(out_dip)
    assert out_dip.shape == (B, output_dim)
    assert bool(jnp.all(jnp.isfinite(out_dip)))

    # full fusion path
    final_f, final_c, final_t, path_attn, causal_attn = model(
        feature_index, rel_index, feat_index, only_dipole=False, p=0.5)
    jax.block_until_ready((final_f, final_c, final_t))
    assert final_f.shape == (B, output_dim)
    assert final_c.shape == (B, output_dim)
    assert final_t.shape == (B, output_dim)
    assert bool(jnp.all(jnp.isfinite(final_f)))
    assert bool(jnp.all(jnp.isfinite(final_c)))
    assert bool(jnp.all(jnp.isfinite(final_t)))

    print("KERNEL_OK")
</pallas_src>

<mosaic_0001>
module attributes {stable_mosaic.version = 11 : i64} {
  func.func @_fused_kernel(%arg0: memref<1xf32, #tpu.memory_space<smem>>, %arg1: memref<64x16xf32, #tpu.memory_space<vmem>>, %arg2: memref<16x128xf32, #tpu.memory_space<vmem>>, %arg3: memref<32x128xf32, #tpu.memory_space<vmem>>, %arg4: memref<1x128xf32, #tpu.memory_space<vmem>>, %arg5: memref<32x128xf32, #tpu.memory_space<vmem>>, %arg6: memref<1x128xf32, #tpu.memory_space<vmem>>, %arg7: memref<32x128xf32, #tpu.memory_space<vmem>>, %arg8: memref<32x128xf32, #tpu.memory_space<vmem>>, %arg9: memref<32x128xf32, #tpu.memory_space<vmem>>, %arg10: memref<128x128xf32, #tpu.memory_space<vmem>>, %arg11: memref<128x128xf32, #tpu.memory_space<vmem>>, %arg12: memref<128x128xf32, #tpu.memory_space<vmem>>, %arg13: memref<8x128xf32, #tpu.memory_space<vmem>>, %arg14: memref<24x128xf32, #tpu.memory_space<vmem>>) attributes {dimension_semantics = [], scalar_prefetch = 0 : i64, scratch_operands = 0 : i64, tpu.core_type = #tpu.core_type<tc>} {
    %c0 = arith.constant 0 : index
    %c0_0 = arith.constant 0 : index
    %0 = vector.load %arg1[%c0, %c0_0] : memref<64x16xf32, #tpu.memory_space<vmem>>, vector<64x16xf32>
    %c0_1 = arith.constant 0 : index
    %c0_2 = arith.constant 0 : index
    %1 = vector.load %arg2[%c0_1, %c0_2] : memref<16x128xf32, #tpu.memory_space<vmem>>, vector<16x128xf32>
    %2 = arith.truncf %0 : vector<64x16xf32> to vector<64x16xbf16>
    %3 = arith.truncf %1 : vector<16x128xf32> to vector<16x128xbf16>
    %cst = arith.constant dense<0.000000e+00> : vector<64x128xf32>
    %4 = tpu.matmul %2, %3, %cst {dimension_numbers = #tpu.dot_dimension_numbers<[1], [0], [0], [1], [0, 0, 1, 1], [], []>} : vector<64x16xbf16>, vector<16x128xbf16>, vector<64x128xf32> -> vector<64x128xf32>
    %c0_3 = arith.constant 0 : index
    %c0_4 = arith.constant 0 : index
    %5 = vector.load %arg4[%c0_3, %c0_4] : memref<1x128xf32, #tpu.memory_space<vmem>>, vector<1x128xf32>
    %6 = vector.broadcast %5 : vector<1x128xf32> to vector<64x128xf32>
    %7 = arith.addf %4, %6 : vector<64x128xf32>
    %c0_5 = arith.constant 0 : index
    %c0_6 = arith.constant 0 : index
    %8 = vector.load %arg3[%c0_5, %c0_6] : memref<32x128xf32, #tpu.memory_space<vmem>>, vector<32x128xf32>
    %9 = arith.truncf %8 : vector<32x128xf32> to vector<32x128xbf16>
    %cst_7 = arith.constant 0.000000e+00 : f32
    %10 = vector.broadcast %cst_7 : f32 to vector<8x32xf32>
    %cst_8 = arith.constant 0.000000e+00 : f32
    %11 = vector.broadcast %cst_8 : f32 to vector<8x32xf32>
    %cst_9 = arith.constant 0.000000e+00 : f32
    %12 = vector.broadcast %cst_9 : f32 to vector<8x32xf32>
    %13 = vector.extract_strided_slice %7 {offsets = [0, 0], sizes = [8, 128], strides = [1, 1]} : vector<64x128xf32> to vector<8x128xf32>
    %14 = arith.truncf %10 : vector<8x32xf32> to vector<8x32xbf16>
    %cst_10 = arith.constant dense<0.000000e+00> : vector<8x128xf32>
    %15 = tpu.matmul %14, %9, %cst_10 {dimension_numbers = #tpu.dot_dimension_numbers<[1], [0], [0], [1], [0, 0, 1, 1], [], []>} : vector<8x32xbf16>, vector<32x128xbf16>, vector<8x128xf32> -> vector<8x128xf32>
    %16 = arith.addf %13, %15 : vector<8x128xf32>
    %17 = vector.extract_strided_slice %16 {offsets = [0, 0], sizes = [8, 32], strides = [1, 1]} : vector<8x128xf32> to vector<8x32xf32>
    %18 = arith.negf %17 : vector<8x32xf32>
    %19 = math.exp %18 : vector<8x32xf32>
    %cst_11 = arith.constant 1.000000e+00 : f32
    %20 = vector.broadcast %cst_11 : f32 to vector<8x32xf32>
    %21 = arith.addf %20, %19 : vector<8x32xf32>
    %22 = arith.divf %20, %21 : vector<8x32xf32>
    %23 = vector.extract_strided_slice %16 {offsets = [0, 32], sizes = [8, 32], strides = [1, 1]} : vector<8x128xf32> to vector<8x32xf32>
    %24 = arith.negf %23 : vector<8x32xf32>
    %25 = math.exp %24 : vector<8x32xf32>
    %cst_12 = arith.constant 1.000000e+00 : f32
    %26 = vector.broadcast %cst_12 : f32 to vector<8x32xf32>
    %27 = arith.addf %26, %25 : vector<8x32xf32>
    %28 = arith.divf %26, %27 : vector<8x32xf32>
    %29 = vector.extract_strided_slice %16 {offsets = [0, 64], sizes = [8, 32], strides = [1, 1]} : vector<8x128xf32> to vector<8x32xf32>
    %30 = math.tanh %29 : vector<8x32xf32>
    %31 = vector.extract_strided_slice %16 {offsets = [0, 96], sizes = [8, 32], strides = [1, 1]} : vector<8x128xf32> to vector<8x32xf32>
    %32 = arith.negf %31 : vector<8x32xf32>
    %33 = math.exp %32 : vector<8x32xf32>
    %cst_13 = arith.constant 1.000000e+00 : f32
    %34 = vector.broadcast %cst_13 : f32 to vector<8x32xf32>
    %35 = arith.addf %34, %33 : vector<8x32xf32>
    %36 = arith.divf %34, %35 : vector<8x32xf32>
    %37 = arith.mulf %28, %11 : vector<8x32xf32>
    %38 = arith.mulf %22, %30 : vector<8x32xf32>
    %39 = arith.addf %37, %38 : vector<8x32xf32>
    %40 = math.tanh %39 : vector<8x32xf32>
    %41 = arith.mulf %36, %40 : vector<8x32xf32>
    %42 = arith.addf %12, %41 : vector<8x32xf32>
    %43 = vector.extract_strided_slice %7 {offsets = [8, 0], sizes = [8, 128], strides = [1, 1]} : vector<64x128xf32> to vector<8x128xf32>
    %44 = arith.truncf %41 : vector<8x32xf32> to vector<8x32xbf16>
    %cst_14 = arith.constant dense<0.000000e+00> : vector<8x128xf32>
    %45 = tpu.matmul %44, %9, %cst_14 {dimension_numbers = #tpu.dot_dimension_numbers<[1], [0], [0], [1], [0, 0, 1, 1], [], []>} : vector<8x32xbf16>, vector<32x128xbf16>, vector<8x128xf32> -> vector<8x128xf32>
    %46 = arith.addf %43, %45 : vector<8x128xf32>
    %47 = vector.extract_strided_slice %46 {offsets = [0, 0], sizes = [8, 32], strides = [1, 1]} : vector<8x128xf32> to vector<8x32xf32>
    %48 = arith.negf %47 : vector<8x32xf32>
    %49 = math.exp %48 : vector<8x32xf32>
    %cst_15 = arith.constant 1.000000e+00 : f32
    %50 = vector.broadcast %cst_15 : f32 to vector<8x32xf32>
    %51 = arith.addf %50, %49 : vector<8x32xf32>
    %52 = arith.divf %50, %51 : vector<8x32xf32>
    %53 = vector.extract_strided_slice %46 {offsets = [0, 32], sizes = [8, 32], strides = [1, 1]} : vector<8x128xf32> to vector<8x32xf32>
    %54 = arith.negf %53 : vector<8x32xf32>
    %55 = math.exp %54 : vector<8x32xf32>
    %cst_16 = arith.constant 1.000000e+00 : f32
    %56 = vector.broadcast %cst_16 : f32 to vector<8x32xf32>
    %57 = arith.addf %56, %55 : vector<8x32xf32>
    %58 = arith.divf %56, %57 : vector<8x32xf32>
    %59 = vector.extract_strided_slice %46 {offsets = [0, 64], sizes = [8, 32], strides = [1, 1]} : vector<8x128xf32> to vector<8x32xf32>
    %60 = math.tanh %59 : vector<8x32xf32>
    %61 = vector.extract_strided_slice %46 {offsets = [0, 96], sizes = [8, 32], strides = [1, 1]} : vector<8x128xf32> to vector<8x32xf32>
    %62 = arith.negf %61 : vector<8x32xf32>
    %63 = math.exp %62 : vector<8x32xf32>
    %cst_17 = arith.constant 1.000000e+00 : f32
    %64 = vector.broadcast %cst_17 : f32 to vector<8x32xf32>
    %65 = arith.addf %64, %63 : vector<8x32xf32>
    %66 = arith.divf %64, %65 : vector<8x32xf32>
    %67 = arith.mulf %58, %39 : vector<8x32xf32>
    %68 = arith.mulf %52, %60 : vector<8x32xf32>
    %69 = arith.addf %67, %68 : vector<8x32xf32>
    %70 = math.tanh %69 : vector<8x32xf32>
    %71 = arith.mulf %66, %70 : vector<8x32xf32>
    %72 = arith.addf %42, %71 : vector<8x32xf32>
    %73 = vector.extract_strided_slice %7 {offsets = [16, 0], sizes = [8, 128], strides = [1, 1]} : vector<64x128xf32> to vector<8x128xf32>
    %74 = arith.truncf %71 : vector<8x32xf32> to vector<8x32xbf16>
    %cst_18 = arith.constant dense<0.000000e+00> : vector<8x128xf32>
    %75 = tpu.matmul %74, %9, %cst_18 {dimension_numbers = #tpu.dot_dimension_numbers<[1], [0], [0], [1], [0, 0, 1, 1], [], []>} : vector<8x32xbf16>, vector<32x128xbf16>, vector<8x128xf32> -> vector<8x128xf32>
    %76 = arith.addf %73, %75 : vector<8x128xf32>
    %77 = vector.extract_strided_slice %76 {offsets = [0, 0], sizes = [8, 32], strides = [1, 1]} : vector<8x128xf32> to vector<8x32xf32>
    %78 = arith.negf %77 : vector<8x32xf32>
    %79 = math.exp %78 : vector<8x32xf32>
    %cst_19 = arith.constant 1.000000e+00 : f32
    %80 = vector.broadcast %cst_19 : f32 to vector<8x32xf32>
    %81 = arith.addf %80, %79 : vector<8x32xf32>
    %82 = arith.divf %80, %81 : vector<8x32xf32>
    %83 = vector.extract_strided_slice %76 {offsets = [0, 32], sizes = [8, 32], strides = [1, 1]} : vector<8x128xf32> to vector<8x32xf32>
    %84 = arith.negf %83 : vector<8x32xf32>
    %85 = math.exp %84 : vector<8x32xf32>
    %cst_20 = arith.constant 1.000000e+00 : f32
    %86 = vector.broadcast %cst_20 : f32 to vector<8x32xf32>
    %87 = arith.addf %86, %85 : vector<8x32xf32>
    %88 = arith.divf %86, %87 : vector<8x32xf32>
    %89 = vector.extract_strided_slice %76 {offsets = [0, 64], sizes = [8, 32], strides = [1, 1]} : vector<8x128xf32> to vector<8x32xf32>
    %90 = math.tanh %89 : vector<8x32xf32>
    %91 = vector.extract_strided_slice %76 {offsets = [0, 96], sizes = [8, 32], strides = [1, 1]} : vector<8x128xf32> to vector<8x32xf32>
    %92 = arith.negf %91 : vector<8x32xf32>
    %93 = math.exp %92 : vector<8x32xf32>
    %cst_21 = arith.constant 1.000000e+00 : f32
    %94 = vector.broadcast %cst_21 : f32 to vector<8x32xf32>
    %95 = arith.addf %94, %93 : vector<8x32xf32>
    %96 = arith.divf %94, %95 : vector<8x32xf32>
    %97 = arith.mulf %88, %69 : vector<8x32xf32>
    %98 = arith.mulf %82, %90 : vector<8x32xf32>
    %99 = arith.addf %97, %98 : vector<8x32xf32>
    %100 = math.tanh %99 : vector<8x32xf32>
    %101 = arith.mulf %96, %100 : vector<8x32xf32>
    %102 = arith.addf %72, %101 : vector<8x32xf32>
    %103 = vector.extract_strided_slice %7 {offsets = [24, 0], sizes = [8, 128], strides = [1, 1]} : vector<64x128xf32> to vector<8x128xf32>
    %104 = arith.truncf %101 : vector<8x32xf32> to vector<8x32xbf16>
    %cst_22 = arith.constant dense<0.000000e+00> : vector<8x128xf32>
    %105 = tpu.matmul %104, %9, %cst_22 {dimension_numbers = #tpu.dot_dimension_numbers<[1], [0], [0], [1], [0, 0, 1, 1], [], []>} : vector<8x32xbf16>, vector<32x128xbf16>, vector<8x128xf32> -> vector<8x128xf32>
    %106 = arith.addf %103, %105 : vector<8x128xf32>
    %107 = vector.extract_strided_slice %106 {offsets = [0, 0], sizes = [8, 32], strides = [1, 1]} : vector<8x128xf32> to vector<8x32xf32>
    %108 = arith.negf %107 : vector<8x32xf32>
    %109 = math.exp %108 : vector<8x32xf32>
    %cst_23 = arith.constant 1.000000e+00 : f32
    %110 = vector.broadcast %cst_23 : f32 to vector<8x32xf32>
    %111 = arith.addf %110, %109 : vector<8x32xf32>
    %112 = arith.divf %110, %111 : vector<8x32xf32>
    %113 = vector.extract_strided_slice %106 {offsets = [0, 32], sizes = [8, 32], strides = [1, 1]} : vector<8x128xf32> to vector<8x32xf32>
    %114 = arith.negf %113 : vector<8x32xf32>
    %115 = math.exp %114 : vector<8x32xf32>
    %cst_24 = arith.constant 1.000000e+00 : f32
    %116 = vector.broadcast %cst_24 : f32 to vector<8x32xf32>
    %117 = arith.addf %116, %115 : vector<8x32xf32>
    %118 = arith.divf %116, %117 : vector<8x32xf32>
    %119 = vector.extract_strided_slice %106 {offsets = [0, 64], sizes = [8, 32], strides = [1, 1]} : vector<8x128xf32> to vector<8x32xf32>
    %120 = math.tanh %119 : vector<8x32xf32>
    %121 = vector.extract_strided_slice %106 {offsets = [0, 96], sizes = [8, 32], strides = [1, 1]} : vector<8x128xf32> to vector<8x32xf32>
    %122 = arith.negf %121 : vector<8x32xf32>
    %123 = math.exp %122 : vector<8x32xf32>
    %cst_25 = arith.constant 1.000000e+00 : f32
    %124 = vector.broadcast %cst_25 : f32 to vector<8x32xf32>
    %125 = arith.addf %124, %123 : vector<8x32xf32>
    %126 = arith.divf %124, %125 : vector<8x32xf32>
    %127 = arith.mulf %118, %99 : vector<8x32xf32>
    %128 = arith.mulf %112, %120 : vector<8x32xf32>
    %129 = arith.addf %127, %128 : vector<8x32xf32>
    %130 = math.tanh %129 : vector<8x32xf32>
    %131 = arith.mulf %126, %130 : vector<8x32xf32>
    %132 = arith.addf %102, %131 : vector<8x32xf32>
    %133 = vector.extract_strided_slice %7 {offsets = [32, 0], sizes = [8, 128], strides = [1, 1]} : vector<64x128xf32> to vector<8x128xf32>
    %134 = arith.truncf %131 : vector<8x32xf32> to vector<8x32xbf16>
    %cst_26 = arith.constant dense<0.000000e+00> : vector<8x128xf32>
    %135 = tpu.matmul %134, %9, %cst_26 {dimension_numbers = #tpu.dot_dimension_numbers<[1], [0], [0], [1], [0, 0, 1, 1], [], []>} : vector<8x32xbf16>, vector<32x128xbf16>, vector<8x128xf32> -> vector<8x128xf32>
    %136 = arith.addf %133, %135 : vector<8x128xf32>
    %137 = vector.extract_strided_slice %136 {offsets = [0, 0], sizes = [8, 32], strides = [1, 1]} : vector<8x128xf32> to vector<8x32xf32>
    %138 = arith.negf %137 : vector<8x32xf32>
    %139 = math.exp %138 : vector<8x32xf32>
    %cst_27 = arith.constant 1.000000e+00 : f32
    %140 = vector.broadcast %cst_27 : f32 to vector<8x32xf32>
    %141 = arith.addf %140, %139 : vector<8x32xf32>
    %142 = arith.divf %140, %141 : vector<8x32xf32>
    %143 = vector.extract_strided_slice %136 {offsets = [0, 32], sizes = [8, 32], strides = [1, 1]} : vector<8x128xf32> to vector<8x32xf32>
    %144 = arith.negf %143 : vector<8x32xf32>
    %145 = math.exp %144 : vector<8x32xf32>
    %cst_28 = arith.constant 1.000000e+00 : f32
    %146 = vector.broadcast %cst_28 : f32 to vector<8x32xf32>
    %147 = arith.addf %146, %145 : vector<8x32xf32>
    %148 = arith.divf %146, %147 : vector<8x32xf32>
    %149 = vector.extract_strided_slice %136 {offsets = [0, 64], sizes = [8, 32], strides = [1, 1]} : vector<8x128xf32> to vector<8x32xf32>
    %150 = math.tanh %149 : vector<8x32xf32>
    %151 = vector.extract_strided_slice %136 {offsets = [0, 96], sizes = [8, 32], strides = [1, 1]} : vector<8x128xf32> to vector<8x32xf32>
    %152 = arith.negf %151 : vector<8x32xf32>
    %153 = math.exp %152 : vector<8x32xf32>
    %cst_29 = arith.constant 1.000000e+00 : f32
    %154 = vector.broadcast %cst_29 : f32 to vector<8x32xf32>
    %155 = arith.addf %154, %153 : vector<8x32xf32>
    %156 = arith.divf %154, %155 : vector<8x32xf32>
    %157 = arith.mulf %148, %129 : vector<8x32xf32>
    %158 = arith.mulf %142, %150 : vector<8x32xf32>
    %159 = arith.addf %157, %158 : vector<8x32xf32>
    %160 = math.tanh %159 : vector<8x32xf32>
    %161 = arith.mulf %156, %160 : vector<8x32xf32>
    %162 = arith.addf %132, %161 : vector<8x32xf32>
    %163 = vector.extract_strided_slice %7 {offsets = [40, 0], sizes = [8, 128], strides = [1, 1]} : vector<64x128xf32> to vector<8x128xf32>
    %164 = arith.truncf %161 : vector<8x32xf32> to vector<8x32xbf16>
    %cst_30 = arith.constant dense<0.000000e+00> : vector<8x128xf32>
    %165 = tpu.matmul %164, %9, %cst_30 {dimension_numbers = #tpu.dot_dimension_numbers<[1], [0], [0], [1], [0, 0, 1, 1], [], []>} : vector<8x32xbf16>, vector<32x128xbf16>, vector<8x128xf32> -> vector<8x128xf32>
    %166 = arith.addf %163, %165 : vector<8x128xf32>
    %167 = vector.extract_strided_slice %166 {offsets = [0, 0], sizes = [8, 32], strides = [1, 1]} : vector<8x128xf32> to vector<8x32xf32>
    %168 = arith.negf %167 : vector<8x32xf32>
    %169 = math.exp %168 : vector<8x32xf32>
    %cst_31 = arith.constant 1.000000e+00 : f32
    %170 = vector.broadcast %cst_31 : f32 to vector<8x32xf32>
    %171 = arith.addf %170, %169 : vector<8x32xf32>
    %172 = arith.divf %170, %171 : vector<8x32xf32>
    %173 = vector.extract_strided_slice %166 {offsets = [0, 32], sizes = [8, 32], strides = [1, 1]} : vector<8x128xf32> to vector<8x32xf32>
    %174 = arith.negf %173 : vector<8x32xf32>
    %175 = math.exp %174 : vector<8x32xf32>
    %cst_32 = arith.constant 1.000000e+00 : f32
    %176 = vector.broadcast %cst_32 : f32 to vector<8x32xf32>
    %177 = arith.addf %176, %175 : vector<8x32xf32>
    %178 = arith.divf %176, %177 : vector<8x32xf32>
    %179 = vector.extract_strided_slice %166 {offsets = [0, 64], sizes = [8, 32], strides = [1, 1]} : vector<8x128xf32> to vector<8x32xf32>
    %180 = math.tanh %179 : vector<8x32xf32>
    %181 = vector.extract_strided_slice %166 {offsets = [0, 96], sizes = [8, 32], strides = [1, 1]} : vector<8x128xf32> to vector<8x32xf32>
    %182 = arith.negf %181 : vector<8x32xf32>
    %183 = math.exp %182 : vector<8x32xf32>
    %cst_33 = arith.constant 1.000000e+00 : f32
    %184 = vector.broadcast %cst_33 : f32 to vector<8x32xf32>
    %185 = arith.addf %184, %183 : vector<8x32xf32>
    %186 = arith.divf %184, %185 : vector<8x32xf32>
    %187 = arith.mulf %178, %159 : vector<8x32xf32>
    %188 = arith.mulf %172, %180 : vector<8x32xf32>
    %189 = arith.addf %187, %188 : vector<8x32xf32>
    %190 = math.tanh %189 : vector<8x32xf32>
    %191 = arith.mulf %186, %190 : vector<8x32xf32>
    %192 = arith.addf %162, %191 : vector<8x32xf32>
    %193 = vector.extract_strided_slice %7 {offsets = [48, 0], sizes = [8, 128], strides = [1, 1]} : vector<64x128xf32> to vector<8x128xf32>
    %194 = arith.truncf %191 : vector<8x32xf32> to vector<8x32xbf16>
    %cst_34 = arith.constant dense<0.000000e+00> : vector<8x128xf32>
    %195 = tpu.matmul %194, %9, %cst_34 {dimension_numbers = #tpu.dot_dimension_numbers<[1], [0], [0], [1], [0, 0, 1, 1], [], []>} : vector<8x32xbf16>, vector<32x128xbf16>, vector<8x128xf32> -> vector<8x128xf32>
    %196 = arith.addf %193, %195 : vector<8x128xf32>
    %197 = vector.extract_strided_slice %196 {offsets = [0, 0], sizes = [8, 32], strides = [1, 1]} : vector<8x128xf32> to vector<8x32xf32>
    %198 = arith.negf %197 : vector<8x32xf32>
    %199 = math.exp %198 : vector<8x32xf32>
    %cst_35 = arith.constant 1.000000e+00 : f32
    %200 = vector.broadcast %cst_35 : f32 to vector<8x32xf32>
    %201 = arith.addf %200, %199 : vector<8x32xf32>
    %202 = arith.divf %200, %201 : vector<8x32xf32>
    %203 = vector.extract_strided_slice %196 {offsets = [0, 32], sizes = [8, 32], strides = [1, 1]} : vector<8x128xf32> to vector<8x32xf32>
    %204 = arith.negf %203 : vector<8x32xf32>
    %205 = math.exp %204 : vector<8x32xf32>
    %cst_36 = arith.constant 1.000000e+00 : f32
    %206 = vector.broadcast %cst_36 : f32 to vector<8x32xf32>
    %207 = arith.addf %206, %205 : vector<8x32xf32>
    %208 = arith.divf %206, %207 : vector<8x32xf32>
    %209 = vector.extract_strided_slice %196 {offsets = [0, 64], sizes = [8, 32], strides = [1, 1]} : vector<8x128xf32> to vector<8x32xf32>
    %210 = math.tanh %209 : vector<8x32xf32>
    %211 = vector.extract_strided_slice %196 {offsets = [0, 96], sizes = [8, 32], strides = [1, 1]} : vector<8x128xf32> to vector<8x32xf32>
    %212 = arith.negf %211 : vector<8x32xf32>
    %213 = math.exp %212 : vector<8x32xf32>
    %cst_37 = arith.constant 1.000000e+00 : f32
    %214 = vector.broadcast %cst_37 : f32 to vector<8x32xf32>
    %215 = arith.addf %214, %213 : vector<8x32xf32>
    %216 = arith.divf %214, %215 : vector<8x32xf32>
    %217 = arith.mulf %208, %189 : vector<8x32xf32>
    %218 = arith.mulf %202, %210 : vector<8x32xf32>
    %219 = arith.addf %217, %218 : vector<8x32xf32>
    %220 = math.tanh %219 : vector<8x32xf32>
    %221 = arith.mulf %216, %220 : vector<8x32xf32>
    %222 = arith.addf %192, %221 : vector<8x32xf32>
    %223 = vector.extract_strided_slice %7 {offsets = [56, 0], sizes = [8, 128], strides = [1, 1]} : vector<64x128xf32> to vector<8x128xf32>
    %224 = arith.truncf %221 : vector<8x32xf32> to vector<8x32xbf16>
    %cst_38 = arith.constant dense<0.000000e+00> : vector<8x128xf32>
    %225 = tpu.matmul %224, %9, %cst_38 {dimension_numbers = #tpu.dot_dimension_numbers<[1], [0], [0], [1], [0, 0, 1, 1], [], []>} : vector<8x32xbf16>, vector<32x128xbf16>, vector<8x128xf32> -> vector<8x128xf32>
    %226 = arith.addf %223, %225 : vector<8x128xf32>
    %227 = vector.extract_strided_slice %226 {offsets = [0, 0], sizes = [8, 32], strides = [1, 1]} : vector<8x128xf32> to vector<8x32xf32>
    %228 = arith.negf %227 : vector<8x32xf32>
    %229 = math.exp %228 : vector<8x32xf32>
    %cst_39 = arith.constant 1.000000e+00 : f32
    %230 = vector.broadcast %cst_39 : f32 to vector<8x32xf32>
    %231 = arith.addf %230, %229 : vector<8x32xf32>
    %232 = arith.divf %230, %231 : vector<8x32xf32>
    %233 = vector.extract_strided_slice %226 {offsets = [0, 32], sizes = [8, 32], strides = [1, 1]} : vector<8x128xf32> to vector<8x32xf32>
    %234 = arith.negf %233 : vector<8x32xf32>
    %235 = math.exp %234 : vector<8x32xf32>
    %cst_40 = arith.constant 1.000000e+00 : f32
    %236 = vector.broadcast %cst_40 : f32 to vector<8x32xf32>
    %237 = arith.addf %236, %235 : vector<8x32xf32>
    %238 = arith.divf %236, %237 : vector<8x32xf32>
    %239 = vector.extract_strided_slice %226 {offsets = [0, 64], sizes = [8, 32], strides = [1, 1]} : vector<8x128xf32> to vector<8x32xf32>
    %240 = math.tanh %239 : vector<8x32xf32>
    %241 = vector.extract_strided_slice %226 {offsets = [0, 96], sizes = [8, 32], strides = [1, 1]} : vector<8x128xf32> to vector<8x32xf32>
    %242 = arith.negf %241 : vector<8x32xf32>
    %243 = math.exp %242 : vector<8x32xf32>
    %cst_41 = arith.constant 1.000000e+00 : f32
    %244 = vector.broadcast %cst_41 : f32 to vector<8x32xf32>
    %245 = arith.addf %244, %243 : vector<8x32xf32>
    %246 = arith.divf %244, %245 : vector<8x32xf32>
    %247 = arith.mulf %238, %219 : vector<8x32xf32>
    %248 = arith.mulf %232, %240 : vector<8x32xf32>
    %249 = arith.addf %247, %248 : vector<8x32xf32>
    %250 = math.tanh %249 : vector<8x32xf32>
    %251 = arith.mulf %246, %250 : vector<8x32xf32>
    %252 = arith.addf %222, %251 : vector<8x32xf32>
    %c0_42 = arith.constant 0 : index
    %c0_43 = arith.constant 0 : index
    %253 = vector.load %arg5[%c0_42, %c0_43] : memref<32x128xf32, #tpu.memory_space<vmem>>, vector<32x128xf32>
    %254 = arith.truncf %251 : vector<8x32xf32> to vector<8x32xbf16>
    %255 = arith.truncf %253 : vector<32x128xf32> to vector<32x128xbf16>
    %cst_44 = arith.constant dense<0.000000e+00> : vector<8x128xf32>
    %256 = tpu.matmul %254, %255, %cst_44 {dimension_numbers = #tpu.dot_dimension_numbers<[1], [0], [0], [1], [0, 0, 1, 1], [], []>} : vector<8x32xbf16>, vector<32x128xbf16>, vector<8x128xf32> -> vector<8x128xf32>
    %c0_45 = arith.constant 0 : index
    %c0_46 = arith.constant 0 : index
    %257 = vector.load %arg6[%c0_45, %c0_46] : memref<1x128xf32, #tpu.memory_space<vmem>>, vector<1x128xf32>
    %258 = vector.broadcast %257 : vector<1x128xf32> to vector<8x128xf32>
    %259 = arith.addf %256, %258 : vector<8x128xf32>
    %260 = arith.negf %259 : vector<8x128xf32>
    %261 = math.exp %260 : vector<8x128xf32>
    %cst_47 = arith.constant 1.000000e+00 : f32
    %262 = vector.broadcast %cst_47 : f32 to vector<8x128xf32>
    %263 = arith.addf %262, %261 : vector<8x128xf32>
    %264 = arith.divf %262, %263 : vector<8x128xf32>
    %265 = arith.negf %264 : vector<8x128xf32>
    %266 = math.exp %265 : vector<8x128xf32>
    %cst_48 = arith.constant 1.000000e+00 : f32
    %267 = vector.broadcast %cst_48 : f32 to vector<8x128xf32>
    %268 = arith.addf %267, %266 : vector<8x128xf32>
    %269 = arith.divf %267, %268 : vector<8x128xf32>
    %c0_49 = arith.constant 0 : index
    %c0_50 = arith.constant 0 : index
    %270 = vector.load %arg13[%c0_49, %c0_50] : memref<8x128xf32, #tpu.memory_space<vmem>>, vector<8x128xf32>
    tpu.vector_store %arg13[%c0_49, %c0_50], %269 {strides = array<i32>} : memref<8x128xf32, #tpu.memory_space<vmem>>, vector<8x128xf32>,
    %cst_51 = arith.constant 1.250000e-01 : f32
    %271 = vector.broadcast %cst_51 : f32 to vector<8x32xf32>
    %272 = arith.mulf %252, %271 : vector<8x32xf32>
    %c0_52 = arith.constant 0 : index
    %c0_53 = arith.constant 0 : index
    %273 = vector.load %arg7[%c0_52, %c0_53] : memref<32x128xf32, #tpu.memory_space<vmem>>, vector<32x128xf32>
    %274 = arith.truncf %272 : vector<8x32xf32> to vector<8x32xbf16>
    %275 = arith.truncf %273 : vector<32x128xf32> to vector<32x128xbf16>
    %cst_54 = arith.constant dense<0.000000e+00> : vector<8x128xf32>
    %276 = tpu.matmul %274, %275, %cst_54 {dimension_numbers = #tpu.dot_dimension_numbers<[1], [0], [0], [1], [0, 0, 1, 1], [], []>} : vector<8x32xbf16>, vector<32x128xbf16>, vector<8x128xf32> -> vector<8x128xf32>
    %277 = math.tanh %276 : vector<8x128xf32>
    %c0_55 = arith.constant 0 : index
    %c0_56 = arith.constant 0 : index
    %278 = vector.load %arg8[%c0_55, %c0_56] : memref<32x128xf32, #tpu.memory_space<vmem>>, vector<32x128xf32>
    %279 = arith.truncf %272 : vector<8x32xf32> to vector<8x32xbf16>
    %280 = arith.truncf %278 : vector<32x128xf32> to vector<32x128xbf16>
    %cst_57 = arith.constant dense<0.000000e+00> : vector<8x128xf32>
    %281 = tpu.matmul %279, %280, %cst_57 {dimension_numbers = #tpu.dot_dimension_numbers<[1], [0], [0], [1], [0, 0, 1, 1], [], []>} : vector<8x32xbf16>, vector<32x128xbf16>, vector<8x128xf32> -> vector<8x128xf32>
    %282 = math.tanh %281 : vector<8x128xf32>
    %c0_58 = arith.constant 0 : index
    %c0_59 = arith.constant 0 : index
    %283 = vector.load %arg9[%c0_58, %c0_59] : memref<32x128xf32, #tpu.memory_space<vmem>>, vector<32x128xf32>
    %284 = arith.truncf %272 : vector<8x32xf32> to vector<8x32xbf16>
    %285 = arith.truncf %283 : vector<32x128xf32> to vector<32x128xbf16>
    %cst_60 = arith.constant dense<0.000000e+00> : vector<8x128xf32>
    %286 = tpu.matmul %284, %285, %cst_60 {dimension_numbers = #tpu.dot_dimension_numbers<[1], [0], [0], [1], [0, 0, 1, 1], [], []>} : vector<8x32xbf16>, vector<32x128xbf16>, vector<8x128xf32> -> vector<8x128xf32>
    %287 = math.tanh %286 : vector<8x128xf32>
    %288 = tpu.concatenate %277, %282, %287 in 0 : vector<8x128xf32>, vector<8x128xf32>, vector<8x128xf32> -> vector<24x128xf32>
    %c0_61 = arith.constant 0 : index
    %289 = memref.load %arg0[%c0_61] : memref<1xf32, #tpu.memory_space<smem>>
    %c0_62 = arith.constant 0 : index
    %c0_63 = arith.constant 0 : index
    %290 = vector.load %arg10[%c0_62, %c0_63] : memref<128x128xf32, #tpu.memory_space<vmem>>, vector<128x128xf32>
    %291 = arith.truncf %264 : vector<8x128xf32> to vector<8x128xbf16>
    %292 = arith.truncf %290 : vector<128x128xf32> to vector<128x128xbf16>
    %cst_64 = arith.constant dense<0.000000e+00> : vector<8x128xf32>
    %293 = tpu.matmul %291, %292, %cst_64 {dimension_numbers = #tpu.dot_dimension_numbers<[1], [0], [0], [1], [0, 0, 1, 1], [], []>} : vector<8x128xbf16>, vector<128x128xbf16>, vector<8x128xf32> -> vector<8x128xf32>
    %294 = vector.broadcast %289 : f32 to vector<8x128xf32>
    %295 = arith.mulf %294, %293 : vector<8x128xf32>
    %296 = tpu.concatenate %295, %295, %295 in 0 : vector<8x128xf32>, vector<8x128xf32>, vector<8x128xf32> -> vector<24x128xf32>
    %cst_65 = arith.constant 1.000000e+00 : f32
    %297 = arith.subf %cst_65, %289 : f32
    %c0_66 = arith.constant 0 : index
    %c0_67 = arith.constant 0 : index
    %298 = vector.load %arg11[%c0_66, %c0_67] : memref<128x128xf32, #tpu.memory_space<vmem>>, vector<128x128xf32>
    %299 = arith.truncf %288 : vector<24x128xf32> to vector<24x128xbf16>
    %300 = arith.truncf %298 : vector<128x128xf32> to vector<128x128xbf16>
    %cst_68 = arith.constant dense<0.000000e+00> : vector<24x128xf32>
    %301 = tpu.matmul %299, %300, %cst_68 {dimension_numbers = #tpu.dot_dimension_numbers<[1], [0], [0], [1], [0, 0, 1, 1], [], []>} : vector<24x128xbf16>, vector<128x128xbf16>, vector<24x128xf32> -> vector<24x128xf32>
    %302 = vector.broadcast %297 : f32 to vector<24x128xf32>
    %303 = arith.mulf %302, %301 : vector<24x128xf32>
    %304 = arith.addf %296, %303 : vector<24x128xf32>
    %c0_69 = arith.constant 0 : index
    %c0_70 = arith.constant 0 : index
    %305 = vector.load %arg12[%c0_69, %c0_70] : memref<128x128xf32, #tpu.memory_space<vmem>>, vector<128x128xf32>
    %306 = arith.truncf %304 : vector<24x128xf32> to vector<24x128xbf16>
    %307 = arith.truncf %305 : vector<128x128xf32> to vector<128x128xbf16>
    %cst_71 = arith.constant dense<0.000000e+00> : vector<24x128xf32>
    %308 = tpu.matmul %306, %307, %cst_71 {dimension_numbers = #tpu.dot_dimension_numbers<[1], [0], [0], [1], [0, 0, 1, 1], [], []>} : vector<24x128xbf16>, vector<128x128xbf16>, vector<24x128xf32> -> vector<24x128xf32>
    %309 = arith.negf %308 : vector<24x128xf32>
    %310 = math.exp %309 : vector<24x128xf32>
    %cst_72 = arith.constant 1.000000e+00 : f32
    %311 = vector.broadcast %cst_72 : f32 to vector<24x128xf32>
    %312 = arith.addf %311, %310 : vector<24x128xf32>
    %313 = arith.divf %311, %312 : vector<24x128xf32>
    %c0_73 = arith.constant 0 : index
    %c0_74 = arith.constant 0 : index
    %314 = vector.load %arg14[%c0_73, %c0_74] : memref<24x128xf32, #tpu.memory_space<vmem>>, vector<24x128xf32>
    tpu.vector_store %arg14[%c0_73, %c0_74], %313 {strides = array<i32>} : memref<24x128xf32, #tpu.memory_space<vmem>>, vector<24x128xf32>,
    return
  }
}

</mosaic_0001>

<bundles_post_ra>
// kernel: _fused_forward.1
= control target key start
LH: loop header
LB: loop body
LE: loop exit
PB: predicated region body
PF: predicated region fallthrough
CT: control target
= control target key end

     0   :  { %21 = vsyncpa [#allocation4], 0  ;;  %s1572_s0 = inlined_call_operand.<no memory space> [shape: f32[1], index: 0, kind: input, shape index: {}]   ;;  %s1573_s1 = inlined_call_operand.vmem [shape: f32[64,16], index: 1, kind: input, shape index: {}]   ;;  %s1574_s2 = inlined_call_operand.vmem [shape: f32[16,128], index: 2, kind: input, shape index: {}]   ;;  %s1575_s3 = inlined_call_operand.vmem [shape: f32[32,128], index: 3, kind: input, shape index: {}]   ;;  %s1576_s4 = inlined_call_operand.vmem [shape: f32[1,128], index: 4, kind: input, shape index: {}]   ;;  %s1577_s5 = inlined_call_operand.vmem [shape: f32[32,128], index: 5, kind: input, shape index: {}]   ;;  %s1578_s6 = inlined_call_operand.vmem [shape: f32[1,128], index: 6, kind: input, shape index: {}]   ;;  %s1579_s7 = inlined_call_operand.hbm [shape: f32[32,128], index: 7, kind: input, shape index: {}]   ;;  %s1580_s8 = inlined_call_operand.hbm [shape: f32[32,128], index: 8, kind: input, shape index: {}]   ;;  %s1581_s9 = inlined_call_operand.hbm [shape: f32[32,128], index: 9, kind: input, shape index: {}]   ;;  %s1582_s10 = inlined_call_operand.vmem [shape: f32[128,128], index: 10, kind: input, shape index: {}]   ;;  %s1583_s11 = inlined_call_operand.hbm [shape: f32[128,128], index: 11, kind: input, shape index: {}]   ;;  %s1584_s12 = inlined_call_operand.hbm [shape: f32[128,128], index: 12, kind: input, shape index: {}]   ;;  %s1585_s13 = inlined_call_operand.vmem [shape: f32[8,128], index: 13, kind: output, shape index: {0}]   ;;  %s1586_s14 = inlined_call_operand.vmem [shape: f32[24,128], index: 14, kind: output, shape index: {1}]  }
   0x1   :  { %22 = vsyncpa [#allocation6], 0 }
   0x2   :  { %23 = vsyncpa [#allocation9], 0  ;;  %s55_s15 = sshll.u32 %s1580_s8, 4  ;;  %s1263_s16 = smov [#allocation5]   ;;  %s56_s15 = int_to_ptr.hbm [resolvable:$true] %s55_s15 }
   0x3   :  { %s57_s17 = sshll.u32 %s1263_s16, 4  ;;  %s83_s20 = sshll.u32 %s1583_s11, 4  ;;  %s58_s17 = int_to_ptr.vmem [resolvable:$true] %s57_s17  ;;  %s84_s20 = int_to_ptr.hbm [resolvable:$true] %s83_s20 }
   0x4   :  { %s1264_s21 = smov 128   ;;  %s1265_s22 = smov 8  }
   0x5   :  { %63 = dma.hbm_to_vmem [thread:$0]  %s56_s15, 512, %s58_s17, [#allocation6], %s1264_s21, %s1264_s21, %s1265_s22  }
   0x6   :  { %s1266_s23 = smov [#allocation8]   ;;  %s42_s27 = sshll.u32 %s1579_s7, 4  ;;  %s43_s27 = int_to_ptr.hbm [resolvable:$true] %s42_s27 }
   0x7   :  { %s85_s24 = sshll.u32 %s1266_s23, 4  ;;  %s68_s29 = sshll.u32 %s1581_s9, 4  ;;  %s86_s24 = int_to_ptr.vmem [resolvable:$true] %s85_s24  ;;  %s69_s29 = int_to_ptr.hbm [resolvable:$true] %s68_s29 }
   0x8   :  { %91 = dma.hbm_to_vmem [thread:$0]  %s84_s20, 2048, %s86_s24, [#allocation9], %s1264_s21, %s1264_s21, %s1265_s22  }
   0x9   :  { %s1267_s30 = smov [#allocation3]   ;;  %s1268_s11 = smov [#allocation7]  }
   0xa   :  { %s44_s16 = sshll.u32 %s1267_s30, 4  ;;  %s70_s15 = sshll.u32 %s1268_s11, 4  ;;  %s45_s16 = int_to_ptr.vmem [resolvable:$true] %s44_s16  ;;  %s71_s15 = int_to_ptr.vmem [resolvable:$true] %s70_s15 }
   0xb   :  { %50 = dma.hbm_to_vmem [thread:$0]  %s43_s27, 512, %s45_s16, [#allocation4], %s1264_s21, %s1264_s21, %s1265_s22  }
   0xc   :  { %s96_s19 = sshll.u32 %s1584_s12, 4  ;;  %s1269_s7 = smov [#allocation10]   ;;  %s97_s19 = int_to_ptr.hbm [resolvable:$true] %s96_s19 }
   0xd   :  { %76 = dma.hbm_to_vmem [thread:$0]  %s69_s29, 512, %s71_s15, [#allocation6], %s1264_s21, %s1264_s21, %s1265_s22  }
   0xe   :  { %s98_s20 = sshll.u32 %s1269_s7, 4  ;;  %s99_s20 = int_to_ptr.vmem [resolvable:$true] %s98_s20 }
   0xf   :  { %104 = dma.hbm_to_vmem [thread:$0]  %s97_s19, 2048, %s99_s20, [#allocation9], %s1264_s21, %s1264_s21, %s1265_s22  }
  0x10   :  { %1257 = dma.done.wait [#allocation4], 512  }
  0x11   :  { %1258 = vsyncadd [#allocation4], 4294966784 }
  0x12   :  { %1259 = dma.done.wait [#allocation6], 1024  }
  0x13   :  { %1260 = vsyncadd [#allocation6], 4294966272 }
  0x14   :  { %1261 = dma.done.wait [#allocation9], 4096  }
  0x15   :  { %1262 = vsyncadd [#allocation9], 4294963200  ;;  %v134_v0 = vld [vmem:[%s1574_s2] sm:$0xff]  ;;  %v135_v1 = vld [vmem:[%s1574_s2 + $0x8] sm:$0xff]  ;;  %vm145_vm0 = vcmask 130048   ;;  %v1270_v12 = vmov 0  }
  0x16   :  { %v189_v2 = vld [vmem:[%s1575_s3 + $0x10] sm:$0xff]  ;;  %v140_v3 = vpack.c.bf16 %v135_v1, %v134_v0  ;;  %v190_v4 = vld [vmem:[%s1575_s3 + $0x18] sm:$0xff]  ;;  %v126_v5 = vld [vmem:[%s1573_s1] sm:$0xff]  ;;  %s1271_s17 = smov 64   ;;  %vm193_vm5 = vcmask 261120   ;;  %s840_s20 = ssub.f32 1.0, %s1572_s0 }
  0x17   :  { %v127_v6 = vld [vmem:[%s1573_s1 + $0x8] sm:$0xff]  ;;  %v1381_v7 = vpack.c.bf16 %v190_v4, %v189_v2  ;;  %v187_v9 = vld [vmem:[%s1575_s3] sm:$0xff]  ;;  %v128_v4 = vld [vmem:[%s1573_s1 + $0x10] sm:$0xff] }
  0x18   :  { %v136_v8 = vpack.c.bf16 %v127_v6, %v126_v5  ;;  %v188_v10 = vld [vmem:[%s1575_s3 + $0x8] sm:$0xff]  ;;  %165 = vmatpush.bf16.msra.mxu0 %v140_v3  ;;  %v1409_v13 = vld [vmem:[%s1576_s4] ss:$0 sm:$0xff]  ;;  %s1272_s4 = smov 32   ;;  %v129_v5 = vld [vmem:[%s1573_s1 + $0x18] sm:$0xff] }
  0x19   :  { %203 = vmatpush.bf16.msra.mxu3 %v1381_v7  ;;  %v1390_v11 = vpack.c.bf16 %v188_v10, %v187_v9  ;;  %380 = vmatpush.bf16.msra.mxu1 %v1381_v7  ;;  %v137_v6 = vpack.c.bf16 %v129_v5, %v128_v4  ;;  %v130_v4 = vld [vmem:[%s1573_s1 + $0x20] sm:$0xff]  ;;  %v131_v5 = vld [vmem:[%s1573_s1 + $0x28] sm:$0xff] }
  0x1a   :  { %439 = vmatpush.bf16.msra.mxu2 %v1381_v7 }
  0x1b   :  { %1007 = vmatmul.msk.bf16.vlgmr.msra.gmra.mxu0 %vm145_vm0, %v136_v8 }
  0x1d   :  { %204 = vmatpush.bf16.msra.mxu3 %v1390_v11  ;;  %381 = vmatpush.bf16.msra.mxu1 %v1390_v11 }
  0x1e   :  { %440 = vmatpush.bf16.msra.mxu2 %v1390_v11 }
  0x20   :  { %205 = vmatmul.bf16.vlgmr.msra.gmra.mxu3 %v1270_v12 }
  0x21   :  { %262 = vmatpush.bf16.msrb.mxu3 %v1381_v7  ;;  %557 = vmatpush.bf16.msrb.mxu1 %v1381_v7 }
  0x22   :  { %616 = vmatpush.bf16.msrb.mxu2 %v1381_v7 }
  0x25   :  { %263 = vmatpush.bf16.msrb.mxu3 %v1390_v11  ;;  %558 = vmatpush.bf16.msrb.mxu1 %v1390_v11 }
  0x26   :  { %617 = vmatpush.bf16.msrb.mxu2 %v1390_v11 }
  0x29   :  { %321 = vmatpush.bf16.msra.mxu3 %v1381_v7 }
  0x2b   :  { %1008 = vmatmul.msk.bf16.gmra.mxu0 %vm145_vm0, %v137_v6  ;;  %v138_v6 = vpack.c.bf16 %v131_v5, %v130_v4  ;;  %v132_v4 = vld [vmem:[%s1573_s1 + $0x30] sm:$0xff]  ;;  %v133_v5 = vld [vmem:[%s1573_s1 + $0x38] sm:$0xff] }
  0x2d   :  { %322 = vmatpush.bf16.msra.mxu3 %v1390_v11 }
  0x3b   :  { %1009 = vmatmul.msk.bf16.gmra.mxu0 %vm145_vm0, %v138_v6  ;;  %v139_v6 = vpack.c.bf16 %v133_v5, %v132_v4  ;;  %v735_v4 = vld [vmem:[#allocation3 + $0x18] sm:$0xff]  ;;  %v761_v5 = vld [vmem:[#allocation5 + $0x10] sm:$0xff] }
  0x4b   :  { %1010 = vmatmul.msk.bf16.gmra.mxu0 %vm145_vm0, %v139_v6 }
  0x98   :  { %v167_v14 = vpop.f32.mrf.mxu0 }
  0x99   :  { %v168_v15 = vadd.f32 %v1409_v13, %v167_v14 }
  0xa0   :  { %v169_v43 = vpop.f32.mrf.mxu0 }
  0xa1   :  { %v170_v44 = vadd.f32 %v1409_v13, %v169_v43 }
  0xa3   :  { %v206_v16 = vpop.f32.mrf.mxu3 }
  0xa4   :  { %v210_v17 = vadd.f32 %v206_v16, %v168_v15 }
  0xa6   :  { %1047 = vtanh.f32 %v210_v17  ;;  %v1011_v20 = vmul.f32 -1.442695, %v210_v17 }
  0xa8   :  { %1049 = vpow2.f32 %v1011_v20 }
  0xab   :  { %v208_v18 = vpop.f32.mrf.mxu3 }
  0xac   :  { %v1048_v19 = vpop.eup %1047 }
  0xad   :  { %233 = vrot.lane.b32.xlu0 %v1048_v19, %s1271_s17 }
  0xae   :  { %v1050_v21 = vpop.eup %1049 }
  0xaf   :  { %v214_v22 = vadd.f32 1.0, %v1050_v21 }
  0xb1   :  { %1051 = vrcp.f32 %v214_v22  ;;  %v226_v28 = vand.u32 2147483648, %v214_v22  ;;  %vm220_vm2 = vweird.f32 %v214_v22  ;;  %v224_v29 = vand.u32 2147483647, %v214_v22 }
  0xb3   :  { %v227_v31 = vor.u32 1.1754944e-38, %v226_v28  ;;  %vm225_vm4 = vcmp.eq.f32.partialorder %v224_v29, 8.507059e+37 }
  0xb7   :  { %v1052_v23 = vpop.eup %1051 }
  0xb8   :  { %v216_v24 = vmul.f32 %v1052_v23, %v214_v22  ;;  %vm221_vm1 = vweird.f32 %v1052_v23 }
  0xb9   :  { %vm222_vm3 = vmor %vm220_vm2, %vm221_vm1 }
  0xba   :  { %v217_v25 = vsub.f32 1.0, %v216_v24 }
  0xbc   :  { %v218_v26 = vmul.f32 %v1052_v23, %v217_v25 }
  0xbe   :  { %v219_v27 = vadd.f32 %v1052_v23, %v218_v26 }
  0xc0   :  { %v223_v30 = vsel %vm222_vm3, %v1052_v23, %v219_v27 }
  0xc1   :  { %v228_v33 = vsel %vm225_vm4, %v227_v31, %v223_v30 }
  0xc2   :  { %v231_v35 = vmul.f32 0.0, %v228_v33 }
 0x11f   :  { %v234_v32 = vpop.permute.xlu0 %233 }
 0x120   :  { %v236_v34 = vmul.f32 %v234_v32, %v228_v33 }
 0x122   :  { %238 = vrot.lane.b32.xlu0 %v236_v34, %s1272_s4 }
 0x194   :  { %v239_v36 = vpop.permute.xlu0 %238 }
 0x195   :  { %v241_v37 = vadd.f32 %v239_v36, %v231_v35 }
 0x197   :  { %1053 = vtanh.f32 %v241_v37 }
 0x19d   :  { %v1054_v38 = vpop.eup %1053 }
 0x19e   :  { %244 = vrot.lane.b32.xlu1 %v1054_v38, %s1271_s17 }
 0x210   :  { %v245_v39 = vpop.permute.xlu1 %244 }
 0x211   :  { %v1415_v40 = vmul.f32 %v245_v39, %v228_v33 }
 0x213   :  { %v249_v41 = vpack.c.bf16 %v1415_v40, %v1415_v40 }
 0x215   :  { %251 = vrot.lane.b32.xlu1 %v249_v41, %s1272_s4 }
 0x287   :  { %v252_v42 = vpop.permute.xlu1 %251 }
 0x288   :  { %1012 = vmatmul.msk.bf16.vlgmr.msrb.gmra.mxu3 %vm193_vm5, %v252_v42 }
 0x289   :  { %498 = vmatpush.bf16.msrb.mxu3 %v1381_v7 }
 0x28d   :  { %499 = vmatpush.bf16.msrb.mxu3 %v1390_v11  ;;  %v172_v11 = vpop.f32.mrf.mxu0 }
 0x28e   :  { %v173_v12 = vadd.f32 %v1409_v13, %v172_v11 }
 0x30b   :  { %v265_v45 = vpop.f32.mrf.mxu3 }
 0x30c   :  { %v269_v46 = vadd.f32 %v265_v45, %v170_v44  ;;  %v174_v44 = vpop.f32.mrf.mxu0 }
 0x30d   :  { %v175_v45 = vadd.f32 %v1409_v13, %v174_v44 }
 0x30e   :  { %1055 = vtanh.f32 %v269_v46  ;;  %v1013_v49 = vmul.f32 -1.442695, %v269_v46 }
 0x310   :  { %1057 = vpow2.f32 %v1013_v49 }
 0x313   :  { %v267_v47 = vpop.f32.mrf.mxu3 }
 0x314   :  { %v1056_v48 = vpop.eup %1055 }
 0x315   :  { %292 = vrot.lane.b32.xlu2 %v1056_v48, %s1271_s17 }
 0x316   :  { %v1058_v50 = vpop.eup %1057 }
 0x317   :  { %v273_v51 = vadd.f32 1.0, %v1058_v50 }
 0x319   :  { %1059 = vrcp.f32 %v273_v51  ;;  %v285_v57 = vand.u32 2147483648, %v273_v51  ;;  %vm279_vm7 = vweird.f32 %v273_v51  ;;  %v283_v58 = vand.u32 2147483647, %v273_v51 }
 0x31b   :  { %v286_v60 = vor.u32 1.1754944e-38, %v285_v57  ;;  %vm284_vm9 = vcmp.eq.f32.partialorder %v283_v58, 8.507059e+37 }
 0x31f   :  { %v1060_v52 = vpop.eup %1059 }
 0x320   :  { %v275_v53 = vmul.f32 %v1060_v52, %v273_v51  ;;  %vm280_vm6 = vweird.f32 %v1060_v52 }
 0x321   :  { %vm281_vm8 = vmor %vm279_vm7, %vm280_vm6 }
 0x322   :  { %v276_v54 = vsub.f32 1.0, %v275_v53 }
 0x324   :  { %v277_v55 = vmul.f32 %v1060_v52, %v276_v54 }
 0x326   :  { %v278_v56 = vadd.f32 %v1060_v52, %v277_v55 }
 0x328   :  { %v282_v59 = vsel %vm281_vm8, %v1060_v52, %v278_v56 }
 0x329   :  { %v287_v62 = vsel %vm284_vm9, %v286_v60, %v282_v59 }
 0x32a   :  { %v290_v0 = vmul.f32 %v287_v62, %v241_v37 }
 0x36f   :  { %v293_v61 = vpop.permute.xlu2 %292 }
 0x370   :  { %v295_v63 = vmul.f32 %v293_v61, %v287_v62 }
 0x372   :  { %297 = vrot.lane.b32.xlu2 %v295_v63, %s1272_s4 }
 0x3cc   :  { %v298_v1 = vpop.permute.xlu2 %297 }
 0x3cd   :  { %v300_v2 = vadd.f32 %v298_v1, %v290_v0 }
 0x3cf   :  { %1061 = vtanh.f32 %v300_v2 }
 0x3d5   :  { %v1062_v3 = vpop.eup %1061 }
 0x3d6   :  { %303 = vrot.lane.b32.xlu0 %v1062_v3, %s1271_s17 }
 0x448   :  { %v304_v7 = vpop.permute.xlu0 %303 }
 0x449   :  { %v306_v8 = vmul.f32 %v304_v7, %v287_v62 }
 0x44b   :  { %v308_v9 = vpack.c.bf16 %v306_v8, %v306_v8  ;;  %v307_v38 = vadd.f32 %v306_v8, %v1415_v40 }
 0x44d   :  { %310 = vrot.lane.b32.xlu1 %v308_v9, %s1272_s4 }
 0x4bf   :  { %v311_v10 = vpop.permute.xlu1 %310 }
 0x4c0   :  { %1014 = vmatmul.msk.bf16.vlgmr.msra.gmra.mxu3 %vm193_vm5, %v311_v10 }
 0x543   :  { %v324_v14 = vpop.f32.mrf.mxu3 }
 0x544   :  { %v328_v15 = vadd.f32 %v324_v14, %v173_v12  ;;  %v177_v12 = vpop.f32.mrf.mxu0 }
 0x545   :  { %v178_v14 = vadd.f32 %v1409_v13, %v177_v12 }
 0x546   :  { %1063 = vtanh.f32 %v328_v15  ;;  %v1015_v18 = vmul.f32 -1.442695, %v328_v15 }
 0x548   :  { %1065 = vpow2.f32 %v1015_v18 }
 0x54b   :  { %v326_v16 = vpop.f32.mrf.mxu3 }
 0x54c   :  { %v1064_v17 = vpop.eup %1063  ;;  %v179_v44 = vpop.f32.mrf.mxu0 }
 0x54d   :  { %351 = vrot.lane.b32.xlu2 %v1064_v17, %s1271_s17 }
 0x54e   :  { %v1066_v19 = vpop.eup %1065 }
 0x54f   :  { %v332_v20 = vadd.f32 1.0, %v1066_v19 }
 0x551   :  { %1067 = vrcp.f32 %v332_v20  ;;  %v344_v26 = vand.u32 2147483648, %v332_v20  ;;  %vm338_vm11 = vweird.f32 %v332_v20  ;;  %v342_v27 = vand.u32 2147483647, %v332_v20 }
 0x553   :  { %v345_v29 = vor.u32 1.1754944e-38, %v344_v26  ;;  %vm343_vm13 = vcmp.eq.f32.partialorder %v342_v27, 8.507059e+37 }
 0x554   :  { %v182_v12 = vpop.f32.mrf.mxu0 }
 0x557   :  { %v1068_v21 = vpop.eup %1067 }
 0x558   :  { %v334_v22 = vmul.f32 %v1068_v21, %v332_v20  ;;  %vm339_vm10 = vweird.f32 %v1068_v21 }
 0x559   :  { %vm340_vm12 = vmor %vm338_vm11, %vm339_vm10 }
 0x55a   :  { %v335_v23 = vsub.f32 1.0, %v334_v22 }
 0x55c   :  { %v336_v24 = vmul.f32 %v1068_v21, %v335_v23 }
 0x55e   :  { %v337_v25 = vadd.f32 %v1068_v21, %v336_v24 }
 0x560   :  { %v341_v28 = vsel %vm340_vm12, %v1068_v21, %v337_v25 }
 0x561   :  { %v346_v31 = vsel %vm343_vm13, %v345_v29, %v341_v28 }
 0x562   :  { %v349_v33 = vmul.f32 %v346_v31, %v300_v2 }
 0x5a7   :  { %v352_v30 = vpop.permute.xlu2 %351 }
 0x5a8   :  { %v354_v32 = vmul.f32 %v352_v30, %v346_v31 }
 0x5aa   :  { %356 = vrot.lane.b32.xlu0 %v354_v32, %s1272_s4 }
 0x61c   :  { %v357_v34 = vpop.permute.xlu0 %356 }
 0x61d   :  { %v359_v35 = vadd.f32 %v357_v34, %v349_v33 }
 0x61f   :  { %1069 = vtanh.f32 %v359_v35 }
 0x625   :  { %v1070_v36 = vpop.eup %1069 }
 0x626   :  { %362 = vrot.lane.b32.xlu1 %v1070_v36, %s1271_s17 }
 0x698   :  { %v363_v37 = vpop.permute.xlu1 %362 }
 0x699   :  { %v365_v39 = vmul.f32 %v363_v37, %v346_v31 }
 0x69b   :  { %v366_v41 = vadd.f32 %v365_v39, %v307_v38  ;;  %v367_v42 = vpack.c.bf16 %v365_v39, %v365_v39 }
 0x69d   :  { %369 = vrot.lane.b32.xlu2 %v367_v42, %s1272_s4 }
 0x6f7   :  { %v370_v43 = vpop.permute.xlu2 %369 }
 0x6f8   :  { %1016 = vmatmul.msk.bf16.vlgmr.msra.gmra.mxu1 %vm193_vm5, %v370_v43 }
 0x775   :  { %v383_v46 = vpop.f32.mrf.mxu1 }
 0x776   :  { %v387_v47 = vadd.f32 %v383_v46, %v175_v45  ;;  %v180_v45 = vadd.f32 %v1409_v13, %v179_v44  ;;  %v184_v44 = vpop.f32.mrf.mxu0 }
 0x778   :  { %1071 = vtanh.f32 %v387_v47  ;;  %v1017_v50 = vmul.f32 -1.442695, %v387_v47 }
 0x77a   :  { %1073 = vpow2.f32 %v1017_v50 }
 0x77d   :  { %v385_v48 = vpop.f32.mrf.mxu1 }
 0x77e   :  { %v1072_v49 = vpop.eup %1071 }
 0x77f   :  { %410 = vrot.lane.b32.xlu0 %v1072_v49, %s1271_s17 }
 0x780   :  { %v1074_v40 = vpop.eup %1073 }
 0x781   :  { %v391_v51 = vadd.f32 1.0, %v1074_v40 }
 0x783   :  { %1075 = vrcp.f32 %v391_v51  ;;  %v403_v57 = vand.u32 2147483648, %v391_v51  ;;  %vm397_vm15 = vweird.f32 %v391_v51  ;;  %v401_v58 = vand.u32 2147483647, %v391_v51 }
 0x785   :  { %v404_v60 = vor.u32 1.1754944e-38, %v403_v57  ;;  %vm402_vm2 = vcmp.eq.f32.partialorder %v401_v58, 8.507059e+37 }
 0x789   :  { %v1076_v52 = vpop.eup %1075 }
 0x78a   :  { %v393_v53 = vmul.f32 %v1076_v52, %v391_v51  ;;  %vm398_vm14 = vweird.f32 %v1076_v52 }
 0x78b   :  { %vm399_vm1 = vmor %vm397_vm15, %vm398_vm14 }
 0x78c   :  { %v394_v54 = vsub.f32 1.0, %v393_v53 }
 0x78e   :  { %v395_v55 = vmul.f32 %v1076_v52, %v394_v54 }
 0x790   :  { %v396_v56 = vadd.f32 %v1076_v52, %v395_v55 }
 0x792   :  { %v400_v59 = vsel %vm399_vm1, %v1076_v52, %v396_v56 }
 0x793   :  { %v405_v62 = vsel %vm402_vm2, %v404_v60, %v400_v59 }
 0x794   :  { %v408_v0 = vmul.f32 %v405_v62, %v359_v35 }
 0x7f1   :  { %v411_v61 = vpop.permute.xlu0 %410 }
 0x7f2   :  { %v413_v63 = vmul.f32 %v411_v61, %v405_v62 }
 0x7f4   :  { %415 = vrot.lane.b32.xlu1 %v413_v63, %s1272_s4 }
 0x866   :  { %v416_v1 = vpop.permute.xlu1 %415 }
 0x867   :  { %v418_v2 = vadd.f32 %v416_v1, %v408_v0 }
 0x869   :  { %1077 = vtanh.f32 %v418_v2 }
 0x86f   :  { %v1078_v3 = vpop.eup %1077 }
 0x870   :  { %421 = vrot.lane.b32.xlu2 %v1078_v3, %s1271_s17 }
 0x8ca   :  { %v422_v7 = vpop.permute.xlu2 %421 }
 0x8cb   :  { %v424_v8 = vmul.f32 %v422_v7, %v405_v62 }
 0x8cd   :  { %v425_v9 = vadd.f32 %v424_v8, %v366_v41  ;;  %v426_v10 = vpack.c.bf16 %v424_v8, %v424_v8 }
 0x8cf   :  { %428 = vrot.lane.b32.xlu0 %v426_v10, %s1272_s4 }
 0x941   :  { %v429_v11 = vpop.permute.xlu0 %428 }
 0x942   :  { %1018 = vmatmul.msk.bf16.vlgmr.msra.gmra.mxu2 %vm193_vm5, %v429_v11 }
 0x9c5   :  { %v442_v15 = vpop.f32.mrf.mxu2 }
 0x9c6   :  { %v446_v16 = vadd.f32 %v442_v15, %v178_v14  ;;  %v183_v14 = vadd.f32 %v1409_v13, %v182_v12  ;;  %v760_v12 = vld [vmem:[#allocation5 + $0x8] sm:$0xff] }
 0x9c8   :  { %1079 = vtanh.f32 %v446_v16  ;;  %v1019_v19 = vmul.f32 -1.442695, %v446_v16 }
 0x9ca   :  { %1081 = vpow2.f32 %v1019_v19 }
 0x9cd   :  { %v444_v17 = vpop.f32.mrf.mxu2 }
 0x9ce   :  { %v1080_v18 = vpop.eup %1079 }
 0x9cf   :  { %469 = vrot.lane.b32.xlu1 %v1080_v18, %s1271_s17 }
 0x9d0   :  { %v1082_v20 = vpop.eup %1081 }
 0x9d1   :  { %v450_v21 = vadd.f32 1.0, %v1082_v20 }
 0x9d3   :  { %1083 = vrcp.f32 %v450_v21  ;;  %v462_v27 = vand.u32 2147483648, %v450_v21  ;;  %vm456_vm4 = vweird.f32 %v450_v21  ;;  %v460_v28 = vand.u32 2147483647, %v450_v21 }
 0x9d5   :  { %v463_v30 = vor.u32 1.1754944e-38, %v462_v27  ;;  %vm461_vm7 = vcmp.eq.f32.partialorder %v460_v28, 8.507059e+37 }
 0x9d9   :  { %v1084_v22 = vpop.eup %1083 }
 0x9da   :  { %v452_v23 = vmul.f32 %v1084_v22, %v450_v21  ;;  %vm457_vm3 = vweird.f32 %v1084_v22 }
 0x9db   :  { %vm458_vm6 = vmor %vm456_vm4, %vm457_vm3 }
 0x9dc   :  { %v453_v24 = vsub.f32 1.0, %v452_v23 }
 0x9de   :  { %v454_v25 = vmul.f32 %v1084_v22, %v453_v24 }
 0x9e0   :  { %v455_v26 = vadd.f32 %v1084_v22, %v454_v25 }
 0x9e2   :  { %v459_v29 = vsel %vm458_vm6, %v1084_v22, %v455_v26 }
 0x9e3   :  { %v464_v32 = vsel %vm461_vm7, %v463_v30, %v459_v29 }
 0x9e4   :  { %v467_v34 = vmul.f32 %v464_v32, %v418_v2 }
 0xa41   :  { %v470_v31 = vpop.permute.xlu1 %469 }
 0xa42   :  { %v472_v33 = vmul.f32 %v470_v31, %v464_v32 }
 0xa44   :  { %474 = vrot.lane.b32.xlu2 %v472_v33, %s1272_s4 }
 0xa9e   :  { %v475_v35 = vpop.permute.xlu2 %474 }
 0xa9f   :  { %v477_v36 = vadd.f32 %v475_v35, %v467_v34 }
 0xaa1   :  { %1085 = vtanh.f32 %v477_v36 }
 0xaa7   :  { %v1086_v37 = vpop.eup %1085 }
 0xaa8   :  { %480 = vrot.lane.b32.xlu0 %v1086_v37, %s1271_s17 }
 0xb1a   :  { %v481_v38 = vpop.permute.xlu0 %480 }
 0xb1b   :  { %v483_v39 = vmul.f32 %v481_v38, %v464_v32 }
 0xb1d   :  { %v484_v41 = vadd.f32 %v483_v39, %v425_v9  ;;  %v485_v42 = vpack.c.bf16 %v483_v39, %v483_v39 }
 0xb1f   :  { %487 = vrot.lane.b32.xlu1 %v485_v42, %s1272_s4 }
 0xb91   :  { %v488_v43 = vpop.permute.xlu1 %487 }
 0xb92   :  { %1020 = vmatmul.msk.bf16.vlgmr.msrb.gmra.mxu3 %vm193_vm5, %v488_v43 }
 0xc15   :  { %v501_v46 = vpop.f32.mrf.mxu3 }
 0xc16   :  { %v505_v47 = vadd.f32 %v501_v46, %v180_v45  ;;  %v185_v45 = vadd.f32 %v1409_v13, %v184_v44 }
 0xc18   :  { %1087 = vtanh.f32 %v505_v47  ;;  %v1021_v50 = vmul.f32 -1.442695, %v505_v47 }
 0xc1a   :  { %1089 = vpow2.f32 %v1021_v50 }
 0xc1d   :  { %v503_v48 = vpop.f32.mrf.mxu3 }
 0xc1e   :  { %v1088_v49 = vpop.eup %1087 }
 0xc1f   :  { %528 = vrot.lane.b32.xlu2 %v1088_v49, %s1271_s17 }
 0xc20   :  { %v1090_v40 = vpop.eup %1089 }
 0xc21   :  { %v509_v51 = vadd.f32 1.0, %v1090_v40 }
 0xc23   :  { %1091 = vrcp.f32 %v509_v51  ;;  %v521_v57 = vand.u32 2147483648, %v509_v51  ;;  %vm515_vm9 = vweird.f32 %v509_v51  ;;  %v519_v58 = vand.u32 2147483647, %v509_v51 }
 0xc25   :  { %v522_v60 = vor.u32 1.1754944e-38, %v521_v57  ;;  %vm520_vm11 = vcmp.eq.f32.partialorder %v519_v58, 8.507059e+37 }
 0xc29   :  { %v1092_v52 = vpop.eup %1091 }
 0xc2a   :  { %v511_v53 = vmul.f32 %v1092_v52, %v509_v51  ;;  %vm516_vm8 = vweird.f32 %v1092_v52 }
 0xc2b   :  { %vm517_vm10 = vmor %vm515_vm9, %vm516_vm8 }
 0xc2c   :  { %v512_v54 = vsub.f32 1.0, %v511_v53 }
 0xc2e   :  { %v513_v55 = vmul.f32 %v1092_v52, %v512_v54 }
 0xc30   :  { %v514_v56 = vadd.f32 %v1092_v52, %v513_v55 }
 0xc32   :  { %v518_v59 = vsel %vm517_vm10, %v1092_v52, %v514_v56 }
 0xc33   :  { %v523_v62 = vsel %vm520_vm11, %v522_v60, %v518_v59 }
 0xc34   :  { %v526_v0 = vmul.f32 %v523_v62, %v477_v36 }
 0xc79   :  { %v529_v61 = vpop.permute.xlu2 %528 }
 0xc7a   :  { %v531_v63 = vmul.f32 %v529_v61, %v523_v62 }
 0xc7c   :  { %533 = vrot.lane.b32.xlu0 %v531_v63, %s1272_s4 }
 0xcee   :  { %v534_v1 = vpop.permute.xlu0 %533 }
 0xcef   :  { %v536_v2 = vadd.f32 %v534_v1, %v526_v0 }
 0xcf1   :  { %1093 = vtanh.f32 %v536_v2 }
 0xcf7   :  { %v1094_v3 = vpop.eup %1093 }
 0xcf8   :  { %539 = vrot.lane.b32.xlu1 %v1094_v3, %s1271_s17  ;;  %v734_v3 = vld [vmem:[#allocation3 + $0x10] sm:$0xff] }
 0xcf9   :  { %v738_v6 = vpack.c.bf16 %v735_v4, %v734_v3  ;;  %v808_v4 = vld [vmem:[%s1582_s10 + $0x40] sm:$0xff] }
 0xcfb   :  { %751 = vmatpush.bf16.msra.mxu1 %v738_v6 }
 0xd6a   :  { %v540_v7 = vpop.permute.xlu1 %539 }
 0xd6b   :  { %v542_v8 = vmul.f32 %v540_v7, %v523_v62  ;;  %v762_v7 = vld [vmem:[#allocation5 + $0x18] sm:$0xff] }
 0xd6d   :  { %v543_v9 = vadd.f32 %v542_v8, %v484_v41  ;;  %v544_v10 = vpack.c.bf16 %v542_v8, %v542_v8  ;;  %v732_v8 = vld [vmem:[#allocation3] sm:$0xff] }
 0xd6f   :  { %546 = vrot.lane.b32.xlu2 %v544_v10, %s1272_s4  ;;  %v764_v10 = vpack.c.bf16 %v762_v7, %v761_v5  ;;  %v809_v5 = vld [vmem:[%s1582_s10 + $0x48] sm:$0xff] }
 0xd70   :  { %v821_v6 = vpack.c.bf16 %v809_v5, %v808_v4  ;;  %v903_v4 = vld [vmem:[#allocation10 + $0x58] sm:$0xff] }
 0xd71   :  { %771 = vmatpush.bf16.msra.mxu2 %v764_v10  ;;  %v806_v10 = vld [vmem:[%s1582_s10 + $0x30] sm:$0xff] }
 0xdc9   :  { %v547_v11 = vpop.permute.xlu2 %546 }
 0xdca   :  { %1022 = vmatmul.msk.bf16.vlgmr.msrb.gmra.mxu1 %vm193_vm5, %v547_v11  ;;  %v759_v11 = vld [vmem:[#allocation5] sm:$0xff] }
 0xe47   :  { %v560_v15 = vpop.f32.mrf.mxu1 }
 0xe48   :  { %v564_v16 = vadd.f32 %v560_v15, %v183_v14  ;;  %v763_v15 = vpack.c.bf16 %v760_v12, %v759_v11  ;;  %v807_v11 = vld [vmem:[%s1582_s10 + $0x38] sm:$0xff] }
 0xe49   :  { %v820_v12 = vpack.c.bf16 %v807_v11, %v806_v10  ;;  %v899_v10 = vld [vmem:[#allocation10 + $0x38] sm:$0xff] }
 0xe4a   :  { %1095 = vtanh.f32 %v564_v16  ;;  %v1023_v19 = vmul.f32 -1.442695, %v564_v16  ;;  %772 = vmatpush.bf16.msra.mxu2 %v763_v15 }
 0xe4c   :  { %1097 = vpow2.f32 %v1023_v19 }
 0xe4f   :  { %v562_v17 = vpop.f32.mrf.mxu1 }
 0xe50   :  { %v1096_v18 = vpop.eup %1095 }
 0xe51   :  { %587 = vrot.lane.b32.xlu0 %v1096_v18, %s1271_s17 }
 0xe52   :  { %v1098_v20 = vpop.eup %1097 }
 0xe53   :  { %v568_v21 = vadd.f32 1.0, %v1098_v20 }
 0xe55   :  { %1099 = vrcp.f32 %v568_v21  ;;  %v580_v27 = vand.u32 2147483648, %v568_v21  ;;  %vm574_vm12 = vweird.f32 %v568_v21  ;;  %v578_v28 = vand.u32 2147483647, %v568_v21 }
 0xe57   :  { %v581_v30 = vor.u32 1.1754944e-38, %v580_v27  ;;  %vm579_vm14 = vcmp.eq.f32.partialorder %v578_v28, 8.507059e+37  ;;  %v781_v28 = vld [vmem:[#allocation7 + $0x10] sm:$0xff] }
 0xe5b   :  { %v1100_v22 = vpop.eup %1099 }
 0xe5c   :  { %v570_v23 = vmul.f32 %v1100_v22, %v568_v21  ;;  %vm575_vm0 = vweird.f32 %v1100_v22 }
 0xe5d   :  { %vm576_vm13 = vmor %vm574_vm12, %vm575_vm0 }
 0xe5e   :  { %v571_v24 = vsub.f32 1.0, %v570_v23  ;;  %v665_v23 = vld [vmem:[%s1577_s5 + $0x18] sm:$0xff] }
 0xe60   :  { %v572_v25 = vmul.f32 %v1100_v22, %v571_v24  ;;  %v662_v24 = vld [vmem:[%s1577_s5] sm:$0xff] }
 0xe62   :  { %v573_v26 = vadd.f32 %v1100_v22, %v572_v25 }
 0xe64   :  { %v577_v29 = vsel %vm576_vm13, %v1100_v22, %v573_v26  ;;  %v664_v22 = vld [vmem:[%s1577_s5 + $0x10] sm:$0xff]  ;;  %v663_v26 = vld [vmem:[%s1577_s5 + $0x8] sm:$0xff] }
 0xe65   :  { %v582_v32 = vsel %vm579_vm14, %v581_v30, %v577_v29  ;;  %v668_v25 = vpack.c.bf16 %v665_v23, %v664_v22  ;;  %v667_v27 = vpack.c.bf16 %v663_v26, %v662_v24  ;;  %v782_v29 = vld [vmem:[#allocation7 + $0x18] sm:$0xff]  ;;  %v779_v30 = vld [vmem:[#allocation7] sm:$0xff] }
 0xe66   :  { %v585_v34 = vmul.f32 %v582_v32, %v536_v2  ;;  %v803_v22 = vld [vmem:[%s1582_s10 + $0x18] sm:$0xff]  ;;  %v800_v24 = vld [vmem:[%s1582_s10] sm:$0xff] }
 0xe67   :  { %685 = vmatpush.bf16.msra.mxu3 %v668_v25  ;;  %v801_v25 = vld [vmem:[%s1582_s10 + $0x8] sm:$0xff] }
 0xe68   :  { %v817_v26 = vpack.c.bf16 %v801_v25, %v800_v24  ;;  %v885_v25 = vstv %s840_s20 }
 0xe6b   :  { %686 = vmatpush.bf16.msra.mxu3 %v667_v27  ;;  %v1046_v27 = vld [vmem:[%s1578_s6] ss:$0 sm:$0xff] }
 0xec3   :  { %v588_v31 = vpop.permute.xlu0 %587 }
 0xec4   :  { %v590_v33 = vmul.f32 %v588_v31, %v582_v32  ;;  %v784_v31 = vpack.c.bf16 %v782_v29, %v781_v28 }
 0xec6   :  { %592 = vrot.lane.b32.xlu1 %v590_v33, %s1272_s4  ;;  %791 = vmatpush.bf16.msrb.mxu3 %v784_v31 }
 0xf38   :  { %v593_v35 = vpop.permute.xlu1 %592 }
 0xf39   :  { %v595_v36 = vadd.f32 %v593_v35, %v585_v34  ;;  %v855_v35 = vld [vmem:[#allocation8 + $0x70] sm:$0xff] }
 0xf3b   :  { %1101 = vtanh.f32 %v595_v36 }
 0xf41   :  { %v1102_v37 = vpop.eup %1101 }
 0xf42   :  { %598 = vrot.lane.b32.xlu2 %v1102_v37, %s1271_s17  ;;  %v853_v37 = vld [vmem:[#allocation8 + $0x60] sm:$0xff] }
 0xf9c   :  { %v599_v38 = vpop.permute.xlu2 %598 }
 0xf9d   :  { %v601_v39 = vmul.f32 %v599_v38, %v582_v32  ;;  %v780_v32 = vld [vmem:[#allocation7 + $0x8] sm:$0xff] }
 0xf9e   :  { %v783_v33 = vpack.c.bf16 %v780_v32, %v779_v30 }
 0xf9f   :  { %v602_v41 = vadd.f32 %v601_v39, %v543_v9  ;;  %v603_v42 = vpack.c.bf16 %v601_v39, %v601_v39  ;;  %v733_v9 = vld [vmem:[#allocation3 + $0x8] sm:$0xff] }
 0xfa0   :  { %v737_v14 = vpack.c.bf16 %v733_v9, %v732_v8  ;;  %792 = vmatpush.bf16.msrb.mxu3 %v783_v33  ;;  %v854_v39 = vld [vmem:[#allocation8 + $0x68] sm:$0xff] }
 0xfa1   :  { %605 = vrot.lane.b32.xlu0 %v603_v42, %s1272_s4  ;;  %v815_v42 = vld [vmem:[%s1582_s10 + $0x78] sm:$0xff] }
 0xfa2   :  { %752 = vmatpush.bf16.msra.mxu1 %v737_v14 }
0x1013   :  { %v606_v43 = vpop.permute.xlu0 %605 }
0x1014   :  { %1024 = vmatmul.msk.bf16.vlgmr.msrb.gmra.mxu2 %vm193_vm5, %v606_v43  ;;  %v865_v43 = vpack.c.bf16 %v854_v39, %v853_v37 }
0x1097   :  { %v619_v46 = vpop.f32.mrf.mxu2 }
0x1098   :  { %v623_v47 = vadd.f32 %v619_v46, %v185_v45  ;;  %v851_v45 = vld [vmem:[#allocation8 + $0x50] sm:$0xff]  ;;  %v852_v46 = vld [vmem:[#allocation8 + $0x58] sm:$0xff] }
0x109a   :  { %1103 = vtanh.f32 %v623_v47  ;;  %v1025_v50 = vmul.f32 -1.442695, %v623_v47  ;;  %v864_v47 = vpack.c.bf16 %v852_v46, %v851_v45 }
0x109c   :  { %1105 = vpow2.f32 %v1025_v50 }
0x109f   :  { %v621_v48 = vpop.f32.mrf.mxu2 }
0x10a0   :  { %v1104_v49 = vpop.eup %1103  ;;  %v849_v48 = vld [vmem:[#allocation8 + $0x40] sm:$0xff] }
0x10a1   :  { %646 = vrot.lane.b32.xlu1 %v1104_v49, %s1271_s17  ;;  %v850_v49 = vld [vmem:[#allocation8 + $0x48] sm:$0xff] }
0x10a2   :  { %v1106_v40 = vpop.eup %1105  ;;  %v863_v50 = vpack.c.bf16 %v850_v49, %v849_v48 }
0x10a3   :  { %v627_v51 = vadd.f32 1.0, %v1106_v40 }
0x10a5   :  { %1107 = vrcp.f32 %v627_v51  ;;  %v639_v57 = vand.u32 2147483648, %v627_v51  ;;  %vm633_vm1 = vweird.f32 %v627_v51  ;;  %v637_v13 = vand.u32 2147483647, %v627_v51 }
0x10a7   :  { %v640_v59 = vor.u32 1.1754944e-38, %v639_v57  ;;  %vm638_vm3 = vcmp.eq.f32.partialorder %v637_v13, 8.507059e+37  ;;  %v846_v13 = vld [vmem:[#allocation8 + $0x28] sm:$0xff] }
0x10ab   :  { %v1108_v52 = vpop.eup %1107 }
0x10ac   :  { %v629_v53 = vmul.f32 %v1108_v52, %v627_v51  ;;  %vm634_vm15 = vweird.f32 %v1108_v52  ;;  %v847_v51 = vld [vmem:[#allocation8 + $0x30] sm:$0xff] }
0x10ad   :  { %vm635_vm2 = vmor %vm633_vm1, %vm634_vm15 }
0x10ae   :  { %v630_v54 = vsub.f32 1.0, %v629_v53 }
0x10b0   :  { %v631_v55 = vmul.f32 %v1108_v52, %v630_v54  ;;  %v812_v54 = vld [vmem:[%s1582_s10 + $0x60] sm:$0xff] }
0x10b2   :  { %v632_v56 = vadd.f32 %v1108_v52, %v631_v55  ;;  %v813_v55 = vld [vmem:[%s1582_s10 + $0x68] sm:$0xff] }
0x10b3   :  { %v823_v57 = vpack.c.bf16 %v813_v55, %v812_v54 }
0x10b4   :  { %v636_v58 = vsel %vm635_vm2, %v1108_v52, %v632_v56  ;;  %v848_v52 = vld [vmem:[#allocation8 + $0x38] sm:$0xff]  ;;  %v845_v56 = vld [vmem:[#allocation8 + $0x20] sm:$0xff] }
0x10b5   :  { %v641_v61 = vsel %vm638_vm3, %v640_v59, %v636_v58  ;;  %v862_v53 = vpack.c.bf16 %v848_v52, %v847_v51  ;;  %v861_v58 = vpack.c.bf16 %v846_v13, %v845_v56  ;;  %v843_v59 = vld [vmem:[#allocation8 + $0x10] sm:$0xff] }
0x10b6   :  { %v644_v63 = vmul.f32 %v641_v61, %v595_v36  ;;  %v856_v36 = vld [vmem:[#allocation8 + $0x78] sm:$0xff] }
0x10b7   :  { %v866_v38 = vpack.c.bf16 %v856_v36, %v855_v35 }
0x10b9   :  { %867 = vmatpush.bf16.msrb.mxu1 %v866_v38 }
0x10bd   :  { %868 = vmatpush.bf16.msrb.mxu1 %v865_v43 }
0x10c1   :  { %869 = vmatpush.bf16.msrb.mxu1 %v864_v47 }
0x10c5   :  { %870 = vmatpush.bf16.msrb.mxu1 %v863_v50 }
0x10c9   :  { %871 = vmatpush.bf16.msrb.mxu1 %v862_v53 }
0x10cd   :  { %872 = vmatpush.bf16.msrb.mxu1 %v861_v58 }
0x1113   :  { %v647_v60 = vpop.permute.xlu1 %646 }
0x1114   :  { %v649_v62 = vmul.f32 %v647_v60, %v641_v61  ;;  %v844_v60 = vld [vmem:[#allocation8 + $0x18] sm:$0xff] }
0x1116   :  { %651 = vrot.lane.b32.xlu2 %v649_v62, %s1272_s4  ;;  %v810_v62 = vld [vmem:[%s1582_s10 + $0x50] sm:$0xff] }
0x1170   :  { %v652_v0 = vpop.permute.xlu2 %651 }
0x1171   :  { %v654_v1 = vadd.f32 %v652_v0, %v644_v63  ;;  %v811_v63 = vld [vmem:[%s1582_s10 + $0x58] sm:$0xff]  ;;  %v841_v0 = vld [vmem:[#allocation8] sm:$0xff] }
0x1173   :  { %1109 = vtanh.f32 %v654_v1  ;;  %v822_v1 = vpack.c.bf16 %v811_v63, %v810_v62  ;;  %v907_v62 = vld [vmem:[#allocation10 + $0x78] sm:$0xff]  ;;  %v904_v63 = vld [vmem:[#allocation10 + $0x60] sm:$0xff] }
0x1179   :  { %v1110_v2 = vpop.eup %1109 }
0x117a   :  { %657 = vrot.lane.b32.xlu0 %v1110_v2, %s1271_s17  ;;  %v842_v2 = vld [vmem:[#allocation8 + $0x8] sm:$0xff] }
0x117b   :  { %v859_v3 = vpack.c.bf16 %v842_v2, %v841_v0 }
0x11ec   :  { %v658_v16 = vpop.permute.xlu0 %657 }
0x11ed   :  { %v660_v17 = vmul.f32 %v658_v16, %v641_v61  ;;  %v860_v61 = vpack.c.bf16 %v844_v60, %v843_v59  ;;  %v804_v16 = vld [vmem:[%s1582_s10 + $0x20] sm:$0xff] }
0x11ef   :  { %v661_v18 = vadd.f32 %v660_v17, %v602_v41  ;;  %v666_v19 = vpack.c.bf16 %v660_v17, %v660_v17  ;;  %v814_v41 = vld [vmem:[%s1582_s10 + $0x70] sm:$0xff]  ;;  %873 = vmatpush.bf16.msrb.mxu1 %v860_v61  ;;  %v805_v17 = vld [vmem:[%s1582_s10 + $0x28] sm:$0xff] }
0x11f0   :  { %v824_v44 = vpack.c.bf16 %v815_v42, %v814_v41  ;;  %v906_v61 = vld [vmem:[#allocation10 + $0x70] sm:$0xff] }
0x11f1   :  { %v731_v20 = vmul.f32 0.125, %v661_v18  ;;  %674 = vrot.lane.b32.xlu1 %v666_v19, %s1272_s4  ;;  %v917_v0 = vpack.c.bf16 %v907_v62, %v906_v61 }
0x11f2   :  { %825 = vmatpush.bf16.msrb.mxu0 %v824_v44 }
0x11f3   :  { %v736_v21 = vpack.c.bf16 %v731_v20, %v731_v20  ;;  %874 = vmatpush.bf16.msrb.mxu1 %v859_v3  ;;  %v819_v20 = vpack.c.bf16 %v805_v17, %v804_v16  ;;  %918 = vmatpush.bf16.msrb.mxu2 %v917_v0  ;;  %v902_v3 = vld [vmem:[#allocation10 + $0x50] sm:$0xff]  ;;  %v895_v17 = vld [vmem:[#allocation10 + $0x18] sm:$0xff] }
0x11f4   :  { %v915_v5 = vpack.c.bf16 %v903_v4, %v902_v3  ;;  %v894_v16 = vld [vmem:[#allocation10 + $0x10] sm:$0xff] }
0x11f5   :  { %740 = vrot.lane.b32.xlu2 %v736_v21, %s1272_s4  ;;  %v802_v21 = vld [vmem:[%s1582_s10 + $0x10] sm:$0xff] }
0x11f6   :  { %826 = vmatpush.bf16.msrb.mxu0 %v823_v57  ;;  %v818_v23 = vpack.c.bf16 %v803_v22, %v802_v21 }
0x11fa   :  { %827 = vmatpush.bf16.msrb.mxu0 %v822_v1  ;;  %v905_v1 = vld [vmem:[#allocation10 + $0x68] sm:$0xff] }
0x11fb   :  { %v916_v2 = vpack.c.bf16 %v905_v1, %v904_v63 }
0x11fd   :  { %919 = vmatpush.bf16.msrb.mxu2 %v916_v2 }
0x11fe   :  { %828 = vmatpush.bf16.msrb.mxu0 %v821_v6  ;;  %v900_v6 = vld [vmem:[#allocation10 + $0x40] sm:$0xff] }
0x1201   :  { %920 = vmatpush.bf16.msrb.mxu2 %v915_v5 }
0x1202   :  { %829 = vmatpush.bf16.msrb.mxu0 %v820_v12  ;;  %v896_v12 = vld [vmem:[#allocation10 + $0x20] sm:$0xff] }
0x1206   :  { %830 = vmatpush.bf16.msrb.mxu0 %v819_v20  ;;  %v893_v20 = vld [vmem:[#allocation10 + $0x8] sm:$0xff] }
0x120a   :  { %831 = vmatpush.bf16.msrb.mxu0 %v818_v23 }
0x120e   :  { %832 = vmatpush.bf16.msrb.mxu0 %v817_v26  ;;  %v838_v26 = vstv %s1572_s0 }
0x124f   :  { %v741_v34 = vpop.permute.xlu2 %740 }
0x1250   :  { %1029 = vmatmul.msk.bf16.vlgmr.msra.gmra.mxu1 %vm193_vm5, %v741_v34  ;;  %1030 = vmatmul.msk.bf16.vlgmr.msra.gmra.mxu2 %vm193_vm5, %v741_v34 }
0x1263   :  { %v675_v40 = vpop.permute.xlu1 %674 }
0x1264   :  { %1026 = vmatmul.msk.bf16.vlgmr.msra.gmra.mxu3 %vm193_vm5, %v675_v40 }
0x1274   :  { %1031 = vmatmul.msk.bf16.vlgmr.msrb.gmra.mxu3 %vm193_vm5, %v741_v34 }
0x12cd   :  { %v754_v7 = vpop.f32.mrf.mxu1 }
0x12ce   :  { %1111 = vtanh.f32 %v754_v7  ;;  %v901_v7 = vld [vmem:[#allocation10 + $0x48] sm:$0xff] }
0x12d3   :  { %v774_v8 = vpop.f32.mrf.mxu2 }
0x12d4   :  { %1113 = vtanh.f32 %v774_v8  ;;  %v1112_v14 = vpop.eup %1111  ;;  %v914_v8 = vpack.c.bf16 %v901_v7, %v900_v6 }
0x12d5   :  { %v756_v9 = vpop.f32.mrf.mxu1 }
0x12d6   :  { %v898_v9 = vld [vmem:[#allocation10 + $0x30] sm:$0xff]  ;;  %921 = vmatpush.bf16.msrb.mxu2 %v914_v8 }
0x12d7   :  { %v913_v11 = vpack.c.bf16 %v899_v10, %v898_v9 }
0x12da   :  { %v1114_v15 = vpop.eup %1113  ;;  %922 = vmatpush.bf16.msrb.mxu2 %v913_v11 }
0x12db   :  { %v776_v18 = vpop.f32.mrf.mxu2  ;;  %v857_v19 = vpack.c.bf16 %v1114_v15, %v1112_v14  ;;  %v897_v14 = vld [vmem:[#allocation10 + $0x28] sm:$0xff] }
0x12dc   :  { %v912_v15 = vpack.c.bf16 %v897_v14, %v896_v12  ;;  %v911_v18 = vpack.c.bf16 %v895_v17, %v894_v16 }
0x12dd   :  { %875 = vmatmul.bf16.vlgmr.msrb.gmra.mxu1 %v857_v19  ;;  %v892_v19 = vld [vmem:[#allocation10] sm:$0xff] }
0x12de   :  { %923 = vmatpush.bf16.msrb.mxu2 %v912_v15  ;;  %v910_v21 = vpack.c.bf16 %v893_v20, %v892_v19 }
0x12e2   :  { %924 = vmatpush.bf16.msrb.mxu2 %v911_v18 }
0x12e6   :  { %925 = vmatpush.bf16.msrb.mxu2 %v910_v21 }
0x12e7   :  { %v688_v28 = vpop.f32.mrf.mxu3 }
0x12e8   :  { %v689_v29 = vadd.f32 %v1046_v27, %v688_v28 }
0x12ea   :  { %v1027_v30 = vmul.f32 -1.442695, %v689_v29 }
0x12ec   :  { %1115 = vpow2.f32 %v1027_v30 }
0x12ef   :  { %v690_v31 = vpop.f32.mrf.mxu3 }
0x12f2   :  { %v1116_v32 = vpop.eup %1115 }
0x12f3   :  { %v695_v33 = vadd.f32 1.0, %v1116_v32 }
0x12f5   :  { %1117 = vrcp.f32 %v695_v33  ;;  %v707_v42 = vand.u32 2147483648, %v695_v33  ;;  %v705_v44 = vand.u32 2147483647, %v695_v33  ;;  %vm701_vm4 = vweird.f32 %v695_v33 }
0x12f7   :  { %v794_v34 = vpop.f32.mrf.mxu3  ;;  %v708_v46 = vor.u32 1.1754944e-38, %v707_v42  ;;  %vm706_vm7 = vcmp.eq.f32.partialorder %v705_v44, 8.507059e+37 }
0x12f8   :  { %1119 = vtanh.f32 %v794_v34 }
0x12fb   :  { %v1118_v35 = vpop.eup %1117 }
0x12fc   :  { %v697_v36 = vmul.f32 %v1118_v35, %v695_v33  ;;  %vm702_vm5 = vweird.f32 %v1118_v35 }
0x12fd   :  { %vm703_vm6 = vmor %vm701_vm4, %vm702_vm5 }
0x12fe   :  { %v1120_v37 = vpop.eup %1119  ;;  %v698_v38 = vsub.f32 1.0, %v697_v36 }
0x12ff   :  { %v796_v39 = vpop.f32.mrf.mxu3  ;;  %v858_v41 = vpack.c.bf16 %v1120_v37, %v1120_v37 }
0x1300   :  { %v699_v43 = vmul.f32 %v1118_v35, %v698_v38 }
0x1301   :  { %880 = vmatmul.bf16.gmra.mxu1 %v858_v41 }
0x1302   :  { %v700_v45 = vadd.f32 %v1118_v35, %v699_v43 }
0x1304   :  { %v704_v47 = vsel %vm703_vm6, %v1118_v35, %v700_v45 }
0x1305   :  { %v709_v48 = vsel %vm706_vm7, %v708_v46, %v704_v47 }
0x1306   :  { %v1028_v49 = vmul.f32 -1.442695, %v709_v48  ;;  %v816_v50 = vpack.c.bf16 %v709_v48, %v709_v48 }
0x1308   :  { %1121 = vpow2.f32 %v1028_v49  ;;  %833 = vmatmul.bf16.vlgmr.msrb.gmra.mxu0 %v816_v50 }
0x130e   :  { %v1122_v40 = vpop.eup %1121 }
0x130f   :  { %v714_v51 = vadd.f32 1.0, %v1122_v40 }
0x1311   :  { %1123 = vrcp.f32 %v714_v51  ;;  %v726_v55 = vand.u32 2147483648, %v714_v51  ;;  %v724_v57 = vand.u32 2147483647, %v714_v51  ;;  %vm720_vm9 = vweird.f32 %v714_v51 }
0x1313   :  { %v727_v58 = vor.u32 1.1754944e-38, %v726_v55  ;;  %vm725_vm11 = vcmp.eq.f32.partialorder %v724_v57, 8.507059e+37 }
0x1317   :  { %v1124_v52 = vpop.eup %1123 }
0x1318   :  { %v716_v53 = vmul.f32 %v1124_v52, %v714_v51  ;;  %vm721_vm8 = vweird.f32 %v1124_v52 }
0x1319   :  { %vm722_vm10 = vmor %vm720_vm9, %vm721_vm8 }
0x131a   :  { %v717_v54 = vsub.f32 1.0, %v716_v53 }
0x131c   :  { %v718_v56 = vmul.f32 %v1124_v52, %v717_v54 }
0x131e   :  { %v719_v13 = vadd.f32 %v1124_v52, %v718_v56 }
0x1320   :  { %v723_v59 = vsel %vm722_vm10, %v1124_v52, %v719_v13 }
0x1321   :  { %v728_v60 = vsel %vm725_vm11, %v727_v58, %v723_v59 }
0x1322   :  { %730 = vst [vmem:[%s1585_s13] sm:$0xff] %v728_v60 }
0x135a   :  { %v876_v22 = vpop.f32.mrf.mxu1 }
0x135b   :  { %v886_v28 = vmul.f32 %v885_v25, %v876_v22 }
0x1362   :  { %v878_v23 = vpop.f32.mrf.mxu1 }
0x1363   :  { %v887_v29 = vmul.f32 %v885_v25, %v878_v23 }
0x137e   :  { %v881_v24 = vpop.f32.mrf.mxu1 }
0x137f   :  { %v888_v36 = vmul.f32 %v885_v25, %v881_v24 }
0x1385   :  { %v834_v27 = vpop.f32.mrf.mxu0 }
0x1386   :  { %v839_v30 = vmul.f32 %v838_v26, %v834_v27  ;;  %v883_v31 = vpop.f32.mrf.mxu1 }
0x1388   :  { %v889_v32 = vadd.f32 %v886_v28, %v839_v30  ;;  %v890_v33 = vadd.f32 %v887_v29, %v839_v30  ;;  %v891_v37 = vadd.f32 %v888_v36, %v839_v30 }
0x138a   :  { %v908_v34 = vpack.c.bf16 %v890_v33, %v889_v32  ;;  %v909_v38 = vpack.c.bf16 %v891_v37, %v891_v37 }
0x138c   :  { %926 = vmatmul.bf16.vlgmr.msrb.gmra.mxu2 %v908_v34 }
0x138d   :  { %v836_v35 = vpop.f32.mrf.mxu0 }
0x139c   :  { %931 = vmatmul.bf16.gmra.mxu2 %v909_v38 }
0x140f   :  { %v927_v39 = vpop.f32.mrf.mxu2 }
0x1410   :  { %v1032_v41 = vmul.f32 -1.442695, %v927_v39 }
0x1412   :  { %1125 = vpow2.f32 %v1032_v41 }
0x1417   :  { %v929_v42 = vpop.f32.mrf.mxu2 }
0x1418   :  { %v1126_v43 = vpop.eup %1125  ;;  %v1033_v44 = vmul.f32 -1.442695, %v929_v42 }
0x1419   :  { %v945_v45 = vadd.f32 1.0, %v1126_v43 }
0x141a   :  { %1127 = vpow2.f32 %v1033_v44 }
0x141b   :  { %1129 = vrcp.f32 %v945_v45  ;;  %v959_v52 = vand.u32 2147483648, %v945_v45  ;;  %v957_v54 = vand.u32 2147483647, %v945_v45  ;;  %vm953_vm12 = vweird.f32 %v945_v45 }
0x141d   :  { %v960_v58 = vor.u32 1.1754944e-38, %v959_v52  ;;  %vm958_vm14 = vcmp.eq.f32.partialorder %v957_v54, 8.507059e+37 }
0x141f   :  { %v932_v46 = vpop.f32.mrf.mxu2 }
0x1420   :  { %v1128_v47 = vpop.eup %1127  ;;  %v1034_v48 = vmul.f32 -1.442695, %v932_v46 }
0x1421   :  { %v1130_v49 = vpop.eup %1129  ;;  %v946_v50 = vadd.f32 1.0, %v1128_v47 }
0x1422   :  { %v949_v40 = vmul.f32 %v1130_v49, %v945_v45  ;;  %1131 = vpow2.f32 %v1034_v48  ;;  %vm954_vm0 = vweird.f32 %v1130_v49 }
0x1423   :  { %1133 = vrcp.f32 %v946_v50  ;;  %vm955_vm13 = vmor %vm953_vm12, %vm954_vm0  ;;  %v974_v0 = vand.u32 2147483648, %v946_v50  ;;  %v972_v2 = vand.u32 2147483647, %v946_v50  ;;  %vm968_vm1 = vweird.f32 %v946_v50 }
0x1424   :  { %v950_v51 = vsub.f32 1.0, %v949_v40 }
0x1425   :  { %v975_v5 = vor.u32 1.1754944e-38, %v974_v0  ;;  %vm973_vm3 = vcmp.eq.f32.partialorder %v972_v2, 8.507059e+37 }
0x1426   :  { %v951_v53 = vmul.f32 %v1130_v49, %v950_v51 }
0x1427   :  { %v934_v55 = vpop.f32.mrf.mxu2 }
0x1428   :  { %v1132_v56 = vpop.eup %1131  ;;  %v952_v57 = vadd.f32 %v1130_v49, %v951_v53 }
0x1429   :  { %v1134_v13 = vpop.eup %1133  ;;  %v947_v59 = vadd.f32 1.0, %v1132_v56 }
0x142a   :  { %v956_v60 = vsel %vm955_vm13, %v1130_v49, %v952_v57  ;;  %v964_v61 = vmul.f32 %v1134_v13, %v946_v50  ;;  %vm969_vm15 = vweird.f32 %v1134_v13 }
0x142b   :  { %v961_v62 = vsel %vm958_vm14, %v960_v58, %v956_v60  ;;  %1135 = vrcp.f32 %v947_v59  ;;  %vm970_vm2 = vmor %vm968_vm1, %vm969_vm15  ;;  %v989_v10 = vand.u32 2147483648, %v947_v59  ;;  %v987_v12 = vand.u32 2147483647, %v947_v59 }
0x142c   :  { %993 = vst [vmem:[%s1586_s14] sm:$0xff] %v961_v62  ;;  %v965_v63 = vsub.f32 1.0, %v964_v61  ;;  %vm983_vm4 = vweird.f32 %v947_v59 }
0x142d   :  { %v990_v15 = vor.u32 1.1754944e-38, %v989_v10  ;;  %vm988_vm7 = vcmp.eq.f32.partialorder %v987_v12, 8.507059e+37 }
0x142e   :  { %v966_v1 = vmul.f32 %v1134_v13, %v965_v63 }
0x1430   :  { %v967_v3 = vadd.f32 %v1134_v13, %v966_v1 }
0x1431   :  { %v1136_v4 = vpop.eup %1135 }
0x1432   :  { %v971_v6 = vsel %vm970_vm2, %v1134_v13, %v967_v3  ;;  %v979_v7 = vmul.f32 %v1136_v4, %v947_v59  ;;  %vm984_vm5 = vweird.f32 %v1136_v4 }
0x1433   :  { %v976_v8 = vsel %vm973_vm3, %v975_v5, %v971_v6  ;;  %vm985_vm6 = vmor %vm983_vm4, %vm984_vm5 }
0x1434   :  { %994 = vst [vmem:[%s1586_s14 + $0x8] sm:$0xff] %v976_v8  ;;  %v980_v9 = vsub.f32 1.0, %v979_v7 }
0x1436   :  { %v981_v11 = vmul.f32 %v1136_v4, %v980_v9 }
0x1438   :  { %v982_v14 = vadd.f32 %v1136_v4, %v981_v11 }
0x143a   :  { %v986_v16 = vsel %vm985_vm6, %v1136_v4, %v982_v14 }
0x143b   :  { %v991_v17 = vsel %vm988_vm7, %v990_v15, %v986_v16 }
0x143c   :  { %995 = vst [vmem:[%s1586_s14 + $0x10] sm:$0xff] %v991_v17 }
0x143d   :  { %1004 = vsyncpa [#allocation4], 1 }
0x143e   :  { %1005 = vsyncpa [#allocation6], 1 }
0x143f   :  { %1006 = vsyncpa [#allocation9], 1 }

</bundles_post_ra>
